<compile_context>
chip_gen: v7x
topology: tpu7x:2x2x1
jax: 0.10.0
libtpu: 0.0.40
codegen_flags: <defaults>
</compile_context>

<pallas_src>
import functools
import math

import numpy as np
import jax
import jax.numpy as jnp
from jax.experimental import pallas as pl
from jax.experimental.pallas import tpu as pltpu


FREQ_EMB_SIZE = 256     # frequency_embedding_size (even -> no zero-pad branch)
HIDDEN_SIZE = 32        # hidden_size
MAX_PERIOD = 10000.0


def _timestep_embedder_kernel(log_max_period, half, t_ref, w1t_ref, b1_ref,
                              w2t_ref, b2_ref, o_ref):
    # t_ref:    (1, TN)        f32   (timesteps, lane-dense row)
    # w1t_ref:  (H, 2*half)    bf16  (w1 transposed; cols 0..half-1 -> cos part)
    # b1_ref:   (H, 1)         f32
    # w2t_ref:  (H, H)         bf16  (w2 transposed)
    # b2_ref:   (H, 1)         f32
    # o_ref:    (H, TN)        out_dtype  (transposed output, lane-dense)

    # Frequency column generated in-kernel: one iota + one EUP exp over `half` rows.
    row = jax.lax.broadcasted_iota(jnp.int32, (half, 1), 0).astype(jnp.float32)
    freqs = jnp.exp(row * (-log_max_period / half))            # (half, 1)

    t = t_ref[...]                                             # (1, TN)
    args = freqs * t                                           # (half, TN) VPU broadcast

    # emb^T = [cos(args)^T ; sin(args)^T] — sublane-aligned concat (half = 128),
    # giving a single K=256 MXU contraction (fills the 256-deep v6e/v7x array).
    emb_t = jnp.concatenate([jnp.cos(args), jnp.sin(args)], axis=0)   # (2*half, TN) f32

    # Linear 1 (transposed) + bias + SiLU.  bf16 MXU inputs, f32 accumulate.
    h = jnp.dot(w1t_ref[...], emb_t.astype(jnp.bfloat16),
                preferred_element_type=jnp.float32)            # (H, TN)
    h = h + b1_ref[...]
    # SiLU: x * sigmoid(x); divide routed to the EUP via approx reciprocal.
    h = h * pl.reciprocal(1.0 + jnp.exp(-h), approx=True)

    # Linear 2 (transposed)
    out = jnp.dot(w2t_ref[...], h.astype(jnp.bfloat16),
                  preferred_element_type=jnp.float32)          # (H, TN)
    out = out + b2_ref[...]
    o_ref[...] = out.astype(o_ref.dtype)


def prepare_timestep_embedder_params(w1, b1, w2, b2):
    """One-time weight prep (hoisted out of the per-call path): transpose + bf16 cast.

    w1: (freq_emb, H), b1: (H,), w2: (H, H), b2: (H,) stored (in, out) so that
    y = x @ W + b (== PyTorch nn.Linear with its (out, in) weight transposed).
    """
    hidden = w1.shape[1]
    return dict(
        w1t=jnp.asarray(w1).T.astype(jnp.bfloat16),                 # (H, freq_emb)
        b1=jnp.asarray(b1).reshape(hidden, 1).astype(jnp.float32),  # (H, 1)
        w2t=jnp.asarray(w2).T.astype(jnp.bfloat16),                 # (H, H)
        b2=jnp.asarray(b2).reshape(hidden, 1).astype(jnp.float32),  # (H, 1)
    )


def timestep_embedder(t, params,
                      frequency_embedding_size=FREQ_EMB_SIZE,
                      max_period=MAX_PERIOD,
                      block_n=2048,
                      out_dtype=jnp.float32,
                      transposed_output=False):
    """t: (N,) float timesteps.  Returns (N, H) embeddings ((H, N) if transposed_output)."""
    assert frequency_embedding_size % 2 == 0, "odd frequency_embedding_size unsupported"
    half = frequency_embedding_size // 2

    w1t, b1, w2t, b2 = params["w1t"], params["b1"], params["w2t"], params["b2"]
    hidden = w1t.shape[0]
    assert w1t.shape[1] == frequency_embedding_size

    n = t.shape[0]
    if n <= block_n:
        # Single un-padded block (no pad / slice HLO around the kernel; block
        # lane dim == full array dim so the (8,128) rule is satisfied).
        tn, n_pad = n, n
    else:
        assert block_n % 128 == 0, "block_n must be a multiple of 128 for lane-dense blocks"
        tn = block_n
        n_pad = ((n + tn - 1) // tn) * tn

    t_row = t.astype(jnp.float32).reshape(1, n)
    if n_pad != n:
        t_row = jnp.pad(t_row, ((0, 0), (0, n_pad - n)))   # padded cols compute t=0, sliced off

    resident = lambda i: (0, 0)   # weights/biases stay resident in VMEM across the grid
    kernel = functools.partial(_timestep_embedder_kernel, math.log(max_period), half)

    out_t = pl.pallas_call(
        kernel,
        out_shape=jax.ShapeDtypeStruct((hidden, n_pad), out_dtype),
        grid=(n_pad // tn,),
        in_specs=[
            pl.BlockSpec((1, tn), lambda i: (0, i)),                       # t row
            pl.BlockSpec((hidden, frequency_embedding_size), resident),    # w1^T
            pl.BlockSpec((hidden, 1), resident),                           # b1
            pl.BlockSpec((hidden, hidden), resident),                      # w2^T
            pl.BlockSpec((hidden, 1), resident),                           # b2
        ],
        out_specs=pl.BlockSpec((hidden, tn), lambda i: (0, i)),
        compiler_params=pltpu.CompilerParams(
            dimension_semantics=("parallel",)),
    )(t_row, w1t, b1, w2t, b2)

    if n_pad != n:
        out_t = out_t[:, :n]
    if transposed_output:
        return out_t          # (H, N) — for consumers that can fuse the transpose
    return out_t.T            # (N, H) — module semantics


def _reference(t, w1, b1, w2, b2, dim=FREQ_EMB_SIZE, max_period=MAX_PERIOD):
    half = dim // 2
    freqs = jnp.exp(-np.log(max_period) * jnp.arange(half, dtype=jnp.float32) / half)
    args = t.astype(jnp.float32)[:, None] * freqs[None]
    emb = jnp.concatenate([jnp.cos(args), jnp.sin(args)], axis=-1)
    h = emb @ w1 + b1
    h = h * jax.nn.sigmoid(h)
    return h @ w2 + b2


if __name__ == "__main__":
    key = jax.random.PRNGKey(0)
    k_t, k_w1, k_b1, k_w2, k_b2, k_t2 = jax.random.split(key, 6)

    N = 8
    # Fractional timesteps in [0, 1000) like diffusion timesteps.
    t = jax.random.uniform(k_t, (N,), dtype=jnp.float32) * 1000.0

    # Deterministic synthetic parameters (shapes from nn.Linear in __init__),
    # stored (in, out) so the computation is x @ W + b.
    w1 = jax.random.normal(k_w1, (FREQ_EMB_SIZE, HIDDEN_SIZE), jnp.float32) * 0.02
    b1 = jax.random.normal(k_b1, (HIDDEN_SIZE,), jnp.float32) * 0.02
    w2 = jax.random.normal(k_w2, (HIDDEN_SIZE, HIDDEN_SIZE), jnp.float32) * 0.02
    b2 = jax.random.normal(k_b2, (HIDDEN_SIZE,), jnp.float32) * 0.02

    params = prepare_timestep_embedder_params(w1, b1, w2, b2)

    # bf16 MXU operands + approx reciprocal -> looser tolerance than pure-f32.
    RTOL, ATOL = 2e-2, 3e-3

    out = timestep_embedder(t, params)
    out = jax.block_until_ready(out)
    ref = _reference(t, w1, b1, w2, b2)
    np.testing.assert_allclose(np.asarray(out), np.asarray(ref), rtol=RTOL, atol=ATOL)
    assert out.shape == (N, HIDDEN_SIZE)

    # Exercise the multi-block grid + lane-padding path (3 grid steps, 84 padded cols).
    N2 = 300
    t2 = jax.random.uniform(k_t2, (N2,), dtype=jnp.float32) * 1000.0
    out2 = timestep_embedder(t2, params, block_n=128)
    out2 = jax.block_until_ready(out2)
    ref2 = _reference(t2, w1, b1, w2, b2)
    np.testing.assert_allclose(np.asarray(out2), np.asarray(ref2), rtol=RTOL, atol=ATOL)
    assert out2.shape == (N2, HIDDEN_SIZE)

    print("KERNEL_OK")
</pallas_src>

<mosaic_0001>
module attributes {stable_mosaic.version = 11 : i64} {
  func.func @_timestep_embedder_kernel(%arg0: i32, %arg1: memref<1x8xf32, #tpu.memory_space<vmem>>, %arg2: memref<32x256xbf16, #tpu.memory_space<vmem>>, %arg3: memref<32x1xf32, #tpu.memory_space<vmem>>, %arg4: memref<32x32xbf16, #tpu.memory_space<vmem>>, %arg5: memref<32x1xf32, #tpu.memory_space<vmem>>, %arg6: memref<32x8xf32, #tpu.memory_space<vmem>>) attributes {dimension_semantics = [#tpu.dimension_semantics<parallel>], iteration_bounds = array<i64: 1>, scalar_prefetch = 0 : i64, scratch_operands = 0 : i64, tpu.core_type = #tpu.core_type<tc>, window_params = [{transform_indices = @transform_0, window_bounds = array<i64: 1, 8>}, {pipeline_mode = #tpu.pipeline_mode<synchronous>, transform_indices = @transform_1, window_bounds = array<i64: 32, 256>}, {pipeline_mode = #tpu.pipeline_mode<synchronous>, transform_indices = @transform_2, window_bounds = array<i64: 32, 1>}, {pipeline_mode = #tpu.pipeline_mode<synchronous>, transform_indices = @transform_3, window_bounds = array<i64: 32, 32>}, {pipeline_mode = #tpu.pipeline_mode<synchronous>, transform_indices = @transform_4, window_bounds = array<i64: 32, 1>}, {transform_indices = @transform_5, window_bounds = array<i64: 32, 8>}]} {
    %0 = tpu.iota {dimensions = array<i32: 0>} : vector<128x1xi32>
    %1 = arith.sitofp %0 : vector<128x1xi32> to vector<128x1xf32>
    %cst = arith.constant -0.0719557852 : f32
    %2 = vector.broadcast %cst : f32 to vector<128x1xf32>
    %3 = arith.mulf %1, %2 : vector<128x1xf32>
    %4 = math.exp %3 : vector<128x1xf32>
    %c0 = arith.constant 0 : index
    %c0_0 = arith.constant 0 : index
    %5 = vector.load %arg1[%c0, %c0_0] : memref<1x8xf32, #tpu.memory_space<vmem>>, vector<1x8xf32>
    %6 = vector.broadcast %4 : vector<128x1xf32> to vector<128x8xf32>
    %7 = vector.broadcast %5 : vector<1x8xf32> to vector<128x8xf32>
    %8 = arith.mulf %6, %7 : vector<128x8xf32>
    %9 = math.cos %8 : vector<128x8xf32>
    %10 = math.sin %8 : vector<128x8xf32>
    %11 = tpu.concatenate %9, %10 in 0 : vector<128x8xf32>, vector<128x8xf32> -> vector<256x8xf32>
    %c0_1 = arith.constant 0 : index
    %c0_2 = arith.constant 0 : index
    %12 = vector.load %arg2[%c0_1, %c0_2] : memref<32x256xbf16, #tpu.memory_space<vmem>>, vector<32x256xbf16>
    %13 = arith.truncf %11 : vector<256x8xf32> to vector<256x8xbf16>
    %cst_3 = arith.constant dense<0.000000e+00> : vector<32x8xf32>
    %14 = tpu.matmul %12, %13, %cst_3 {dimension_numbers = #tpu.dot_dimension_numbers<[1], [0], [0], [1], [0, 0, 1, 1], [], []>} : vector<32x256xbf16>, vector<256x8xbf16>, vector<32x8xf32> -> vector<32x8xf32>
    %c0_4 = arith.constant 0 : index
    %c0_5 = arith.constant 0 : index
    %15 = vector.load %arg3[%c0_4, %c0_5] : memref<32x1xf32, #tpu.memory_space<vmem>>, vector<32x1xf32>
    %16 = vector.broadcast %15 : vector<32x1xf32> to vector<32x8xf32>
    %17 = arith.addf %14, %16 : vector<32x8xf32>
    %cst_6 = arith.constant 0.000000e+00 : f32
    %18 = vector.broadcast %cst_6 : f32 to vector<32x8xf32>
    %19 = arith.subf %18, %17 : vector<32x8xf32>
    %20 = math.exp %19 : vector<32x8xf32>
    %cst_7 = arith.constant 1.000000e+00 : f32
    %21 = vector.broadcast %cst_7 : f32 to vector<32x8xf32>
    %22 = arith.addf %21, %20 : vector<32x8xf32>
    %23 = tpu.reciprocal %22 {approx = true} : vector<32x8xf32> -> vector<32x8xf32>
    %24 = arith.mulf %17, %23 : vector<32x8xf32>
    %c0_8 = arith.constant 0 : index
    %c0_9 = arith.constant 0 : index
    %25 = vector.load %arg4[%c0_8, %c0_9] : memref<32x32xbf16, #tpu.memory_space<vmem>>, vector<32x32xbf16>
    %26 = arith.truncf %24 : vector<32x8xf32> to vector<32x8xbf16>
    %cst_10 = arith.constant dense<0.000000e+00> : vector<32x8xf32>
    %27 = tpu.matmul %25, %26, %cst_10 {dimension_numbers = #tpu.dot_dimension_numbers<[1], [0], [0], [1], [0, 0, 1, 1], [], []>} : vector<32x32xbf16>, vector<32x8xbf16>, vector<32x8xf32> -> vector<32x8xf32>
    %c0_11 = arith.constant 0 : index
    %c0_12 = arith.constant 0 : index
    %28 = vector.load %arg5[%c0_11, %c0_12] : memref<32x1xf32, #tpu.memory_space<vmem>>, vector<32x1xf32>
    %29 = vector.broadcast %28 : vector<32x1xf32> to vector<32x8xf32>
    %30 = arith.addf %27, %29 : vector<32x8xf32>
    %c0_13 = arith.constant 0 : index
    %c0_14 = arith.constant 0 : index
    %31 = vector.load %arg6[%c0_13, %c0_14] : memref<32x8xf32, #tpu.memory_space<vmem>>, vector<32x8xf32>
    tpu.vector_store %arg6[%c0_13, %c0_14], %30 {strides = array<i32>} : memref<32x8xf32, #tpu.memory_space<vmem>>, vector<32x8xf32>,
    return
  }
  func.func @transform_0(%arg0: i32) -> (i32, i32) {
    %c0_i32 = arith.constant 0 : i32
    %c0_i32_0 = arith.constant 0 : i32
    return %c0_i32, %arg0 : i32, i32
  }
  func.func @transform_1(%arg0: i32) -> (i32, i32) {
    %c0_i32 = arith.constant 0 : i32
    %c0_i32_0 = arith.constant 0 : i32
    %c0_i32_1 = arith.constant 0 : i32
    return %c0_i32, %c0_i32_0 : i32, i32
  }
  func.func @transform_2(%arg0: i32) -> (i32, i32) {
    %c0_i32 = arith.constant 0 : i32
    %c0_i32_0 = arith.constant 0 : i32
    %c0_i32_1 = arith.constant 0 : i32
    return %c0_i32, %c0_i32_0 : i32, i32
  }
  func.func @transform_3(%arg0: i32) -> (i32, i32) {
    %c0_i32 = arith.constant 0 : i32
    %c0_i32_0 = arith.constant 0 : i32
    %c0_i32_1 = arith.constant 0 : i32
    return %c0_i32, %c0_i32_0 : i32, i32
  }
  func.func @transform_4(%arg0: i32) -> (i32, i32) {
    %c0_i32 = arith.constant 0 : i32
    %c0_i32_0 = arith.constant 0 : i32
    %c0_i32_1 = arith.constant 0 : i32
    return %c0_i32, %c0_i32_0 : i32, i32
  }
  func.func @transform_5(%arg0: i32) -> (i32, i32) {
    %c0_i32 = arith.constant 0 : i32
    %c0_i32_0 = arith.constant 0 : i32
    return %c0_i32, %arg0 : i32, i32
  }
}

</mosaic_0001>

<bundles_post_ra>
// kernel: tpu_custom_call.1
= control target key start
LH: loop header
LB: loop body
LE: loop exit
PB: predicated region body
PF: predicated region fallthrough
CT: control target
= control target key end

     0   :  { %v21_v0 = vlaneseq  ;;  %v4051_v54 = vmov 683565275   ;;  %v4052_v56 = vmov 2475754826   ;;  %v4053_v58 = vmov 2131351028   ;;  %s5945_s0 = inlined_call_operand.vmem [shape: f32[1,8], index: 0, kind: input, shape index: {}]   ;;  %s5946_s1 = inlined_call_operand.vmem [shape: bf16[32,256], index: 1, kind: input, shape index: {}]   ;;  %s5947_s2 = inlined_call_operand.vmem [shape: f32[32,1], index: 2, kind: input, shape index: {}]   ;;  %s5948_s4 = inlined_call_operand.vmem [shape: f32[32,1], index: 4, kind: input, shape index: {}]   ;;  %s5949_s3 = inlined_call_operand.vmem [shape: bf16[32,32], index: 3, kind: input, shape index: {}]   ;;  %s5950_s5 = inlined_call_operand.vmem [shape: f32[32,8], index: 5, kind: output, shape index: {}]  }
   0x1   :  { %v4097_v14 = vld [vmem:[%s5945_s0] ss:$0 sm:$0xff]  ;;  %v4054_v60 = vmov 2102212464   ;;  %v4055_v62 = vmov 920167782  }
   0x2   :  { %v4088_v1 = vshrl.u32 %v21_v0, 7 }
   0x4   :  { %v23_v2 = vadd.s32 8, %v4088_v1  ;;  %v38_v3 = vcvt.s32.f32 %v4088_v1  ;;  %v24_v4 = vadd.s32 16, %v4088_v1  ;;  %v25_v13 = vadd.s32 24, %v4088_v1 }
   0x5   :  { %v26_v23 = vadd.s32 32, %v4088_v1  ;;  %v27_v25 = vadd.s32 40, %v4088_v1 }
   0x6   :  { %v39_v5 = vcvt.s32.f32 %v23_v2  ;;  %v54_v6 = vmul.f32 -0.071955785, %v38_v3  ;;  %v40_v7 = vcvt.s32.f32 %v24_v4  ;;  %v41_v17 = vcvt.s32.f32 %v25_v13 }
   0x7   :  { %v42_v32 = vcvt.s32.f32 %v26_v23  ;;  %v43_v36 = vcvt.s32.f32 %v27_v25 }
   0x8   :  { %v55_v8 = vmul.f32 -0.071955785, %v39_v5  ;;  %v70_v9 = vmul.f32 1.442695, %v54_v6  ;;  %v56_v10 = vmul.f32 -0.071955785, %v40_v7 }
   0x9   :  { %v57_v27 = vmul.f32 -0.071955785, %v41_v17  ;;  %v4119_v45 = vmul.f32 -0.071955785, %v42_v32  ;;  %v4121_v46 = vmul.f32 -0.071955785, %v43_v36 }
   0xa   :  { %3937 = vpow2.f32 %v70_v9  ;;  %v72_v11 = vmul.f32 1.442695, %v55_v8  ;;  %v74_v12 = vmul.f32 1.442695, %v56_v10  ;;  %v4056_v6 = vmov 1326507024  }
   0xb   :  { %v76_v38 = vmul.f32 1.442695, %v57_v27 }
   0xc   :  { %3939 = vpow2.f32 %v72_v11 }
   0xd   :  { %3941 = vpow2.f32 %v74_v12 }
   0xe   :  { %3943 = vpow2.f32 %v76_v38 }
  0x14   :  { %v3938_v15 = vpop.eup %3937 }
  0x15   :  { %v4100_v16 = vmul.f32 %v3938_v15, %v4097_v14 }
  0x16   :  { %v3940_v18 = vpop.eup %3939 }
  0x17   :  { %v3942_v19 = vpop.eup %3941  ;;  %v4103_v20 = vmul.f32 %v3940_v18, %v4097_v14  ;;  %v125_v21 = vand.u32 2147483647, %v4100_v16  ;;  %v128_v22 = vand.u32 2139095040, %v4100_v16  ;;  %vm127_vm13 = vcmp.lt.s32.totalorder %v4100_v16, 0 }
  0x18   :  { %v4109_v24 = vmul.f32 %v3942_v19, %v4097_v14 }
  0x19   :  { %v129_v26 = vshrl.u32 %v128_v22, 23  ;;  %v132_v28 = vand.u32 8388607, %v125_v21  ;;  %v228_v29 = vand.u32 2147483647, %v4103_v20  ;;  %v231_v30 = vand.u32 2139095040, %v4103_v20 }
  0x1a   :  { %v334_v35 = vand.u32 2139095040, %v4109_v24  ;;  %v331_v49 = vand.u32 2147483647, %v4109_v24  ;;  %vm4222_vm14 = vcmp.le.f32.partialorder %v125_v21, 0.7853982 }
  0x1b   :  { %v3680_v31 = vadd.s32 4294967169, %v129_v26  ;;  %v232_v33 = vshrl.u32 %v231_v30, 23  ;;  %v235_v34 = vand.u32 8388607, %v228_v29  ;;  %v133_v39 = vor.u32 8388608, %v132_v28  ;;  %v4146_v30 = vpop.eup %3943 }
  0x1c   :  { %v335_v42 = vshrl.u32 %v334_v35, 23 }
  0x1d   :  { %v135_v37 = vadd.s32 1, %v3680_v31  ;;  %v3684_v40 = vadd.s32 4294967169, %v232_v33  ;;  %v236_v41 = vor.u32 8388608, %v235_v34  ;;  %v4124_v50 = vshll.u32 %v133_v39, 8 }
  0x1e   :  { %v4128_v52 = vadd.s32 4294967169, %v335_v42 }
  0x1f   :  { %vm136_vm0 = vcmp.gt.s32.totalorder %v135_v37, 0  ;;  %v238_v44 = vadd.s32 1, %v3684_v40  ;;  %v4126_v51 = vshll.u32 %v236_v41, 8 }
  0x20   :  { %v137_v43 = vsel %vm136_vm0, %v135_v37, 0 }
  0x21   :  { %v138_v47 = vshrl.u32 %v137_v43, 5  ;;  %v139_v48 = vand.u32 31, %v137_v43  ;;  %vm239_vm1 = vcmp.gt.s32.totalorder %v238_v44, 0 }
  0x22   :  { %v240_v11 = vsel %vm239_vm1, %v238_v44, 0 }
  0x23   :  { %v140_v53 = vsub.s32 32, %v139_v48  ;;  %v142_v55 = vshll.u32 %v4051_v54, %v139_v48  ;;  %v145_v57 = vshll.u32 %v4052_v56, %v139_v48  ;;  %v148_v59 = vshll.u32 %v4053_v58, %v139_v48 }
  0x24   :  { %v151_v61 = vshll.u32 %v4054_v60, %v139_v48  ;;  %v154_v63 = vshll.u32 %v4055_v62, %v139_v48  ;;  %vm157_vm2 = vcmp.lt.s32.totalorder %v138_v47, 1  ;;  %vm158_vm3 = vcmp.lt.s32.totalorder %v138_v47, 2 }
  0x25   :  { %v141_v0 = vshrl.u32 %v4051_v54, %v140_v53  ;;  %v143_v2 = vshrl.u32 %v4052_v56, %v140_v53  ;;  %v146_v3 = vshrl.u32 %v4053_v58, %v140_v53  ;;  %v149_v4 = vshrl.u32 %v4054_v60, %v140_v53 }
  0x26   :  { %v152_v5 = vshrl.u32 %v4055_v62, %v140_v53  ;;  %v155_v7 = vshrl.u32 %v4056_v6, %v140_v53  ;;  %vm159_vm4 = vcmp.lt.s32.totalorder %v138_v47, 3  ;;  %vm160_vm5 = vcmp.lt.s32.totalorder %v138_v47, 4 }
  0x27   :  { %v144_v8 = vor.u32 %v143_v2, %v142_v55  ;;  %v147_v9 = vor.u32 %v146_v3, %v145_v57  ;;  %v150_v10 = vor.u32 %v149_v4, %v148_v59  ;;  %v241_v15 = vshrl.u32 %v240_v11, 5 }
  0x28   :  { %v153_v12 = vor.u32 %v152_v5, %v151_v61  ;;  %v156_v13 = vor.u32 %v155_v7, %v154_v63  ;;  %v242_v17 = vand.u32 31, %v240_v11  ;;  %v341_v3 = vadd.s32 1, %v4128_v52 }
  0x29   :  { %v161_v18 = vsel %vm157_vm2, %v141_v0, %v144_v8  ;;  %v162_v19 = vsel %vm160_vm5, %v150_v10, 2102212464  ;;  %v165_v22 = vsel %vm157_vm2, %v144_v8, %v147_v9  ;;  %v169_v23 = vsel %vm157_vm2, %v147_v9, %v150_v10 }
  0x2a   :  { %v163_v25 = vsel %vm159_vm4, %v147_v9, %v162_v19  ;;  %v166_v26 = vsel %vm160_vm5, %v153_v12, 920167782  ;;  %v170_v27 = vsel %vm160_vm5, %v156_v13, 1326507024  ;;  %v243_v28 = vsub.s32 32, %v242_v17 }
  0x2b   :  { %v164_v31 = vsel %vm158_vm3, %v161_v18, %v163_v25  ;;  %v167_v32 = vsel %vm159_vm4, %v150_v10, %v166_v26  ;;  %v171_v33 = vsel %vm159_vm4, %v153_v12, %v170_v27  ;;  %v245_v34 = vshll.u32 %v4051_v54, %v242_v17 }
  0x2c   :  { %v168_v35 = vsel %vm158_vm3, %v165_v22, %v167_v32  ;;  %v172_v36 = vsel %vm158_vm3, %v169_v23, %v171_v33  ;;  %v180_v37 = vmul.u32 %v4124_v50, %v164_v31  ;;  %v244_v38 = vshrl.u32 %v4051_v54, %v243_v28 }
  0x2d   :  { %v4157_v39 = vmul.u32.u64.low %v4124_v50, %v172_v36  ;;  %v4158_v40 = vmul.u32.u64.high %v4124_v50, %v172_v36, %v4157_v39  ;;  %v4161_v41 = vmul.u32.u64.low %v4124_v50, %v168_v35  ;;  %v4162_v42 = vmul.u32.u64.high %v4124_v50, %v168_v35, %v4161_v41 }
  0x2e   :  { %v246_v43 = vshrl.u32 %v4052_v56, %v243_v28  ;;  %v248_v44 = vshll.u32 %v4052_v56, %v242_v17  ;;  %v249_v47 = vshrl.u32 %v4053_v58, %v243_v28  ;;  %v251_v48 = vshll.u32 %v4053_v58, %v242_v17 }
  0x2f   :  { %v252_v53 = vshrl.u32 %v4054_v60, %v243_v28  ;;  %v254_v55 = vshll.u32 %v4054_v60, %v242_v17  ;;  %v255_v57 = vshrl.u32 %v4055_v62, %v243_v28  ;;  %v257_v59 = vshll.u32 %v4055_v62, %v242_v17 }
  0x30   :  { %v247_v61 = vor.u32 %v246_v43, %v245_v34  ;;  %v250_v50 = vor.u32 %v249_v47, %v248_v44  ;;  %v258_v63 = vshrl.u32 %v4056_v6, %v243_v28  ;;  %vm260_vm6 = vcmp.lt.s32.totalorder %v241_v15, 1 }
  0x31   :  { %vm182_vm7 = vc.u32 %v4158_v40, %v4161_v41  ;;  %v183_v0 = vadd.s32 1, %v4162_v42  ;;  %v253_v2 = vor.u32 %v252_v53, %v251_v48  ;;  %v256_v4 = vor.u32 %v255_v57, %v254_v55 }
  0x32   :  { %v259_v5 = vor.u32 %v258_v63, %v257_v59  ;;  %vm261_vm8 = vcmp.lt.s32.totalorder %v241_v15, 2  ;;  %vm262_vm9 = vcmp.lt.s32.totalorder %v241_v15, 3  ;;  %vm263_vm10 = vcmp.lt.s32.totalorder %v241_v15, 4 }
  0x33   :  { %v184_v7 = vsel %vm182_vm7, %v183_v0, %v4162_v42  ;;  %v264_v8 = vsel %vm260_vm6, %v244_v38, %v247_v61  ;;  %v268_v9 = vsel %vm260_vm6, %v247_v61, %v250_v50  ;;  %v265_v11 = vsel %vm263_vm10, %v253_v2, 2102212464 }
  0x34   :  { %v185_v10 = vadd.s32 %v184_v7, %v180_v37  ;;  %v269_v12 = vsel %vm263_vm10, %v256_v4, 920167782  ;;  %v272_v13 = vsel %vm260_vm6, %v250_v50, %v253_v2  ;;  %v266_v17 = vsel %vm262_vm9, %v250_v50, %v265_v11 }
  0x35   :  { %v270_v18 = vsel %vm262_vm9, %v253_v2, %v269_v12  ;;  %v273_v19 = vsel %vm263_vm10, %v259_v5, 1326507024  ;;  %vm342_vm11 = vcmp.gt.s32.totalorder %v341_v3, 0  ;;  %v338_v25 = vand.u32 8388607, %v331_v49 }
  0x36   :  { %v186_v52 = vadd.s32 536870912, %v185_v10  ;;  %v271_v22 = vsel %vm261_vm8, %v268_v9, %v270_v18  ;;  %v274_v23 = vsel %vm262_vm9, %v256_v4, %v273_v19  ;;  %v267_v26 = vsel %vm261_vm8, %v264_v8, %v266_v17 }
  0x37   :  { %v275_v27 = vsel %vm261_vm8, %v272_v13, %v274_v23  ;;  %v4188_v28 = vmul.u32.u64.low %v4126_v51, %v271_v22  ;;  %v4189_v31 = vmul.u32.u64.high %v4126_v51, %v271_v22, %v4188_v28  ;;  %v343_v35 = vsel %vm342_vm11, %v341_v3, 0 }
  0x38   :  { %v187_v32 = vshrl.u32 %v186_v52, 30  ;;  %v4193_v33 = vmul.u32.u64.low %v4126_v51, %v275_v27  ;;  %v4194_v34 = vmul.u32.u64.high %v4126_v51, %v275_v27, %v4193_v33  ;;  %v345_v36 = vand.u32 31, %v343_v35 }
  0x39   :  { %v283_v38 = vmul.u32 %v4126_v51, %v267_v26  ;;  %v78_v39 = vmul.f32 1.442695, %v4119_v45  ;;  %v4199_v15 = vadd.s32 48, %v4088_v1  ;;  %v286_v42 = vadd.s32 1, %v4189_v31 }
  0x3a   :  { %v188_v37 = vshll.u32 %v187_v32, 30  ;;  %v80_v43 = vmul.f32 1.442695, %v4121_v46  ;;  %v4204_v44 = vadd.s32 56, %v4088_v1  ;;  %vm285_vm12 = vc.u32 %v4194_v34, %v4188_v28 }
  0x3b   :  { %v339_v48 = vor.u32 8388608, %v338_v25  ;;  %v287_v51 = vsel %vm285_vm12, %v286_v42, %v4189_v31  ;;  %v4213_v45 = vmul.f32 %v4146_v30, %v4097_v14  ;;  %v346_v53 = vsub.s32 32, %v345_v36 }
  0x3c   :  { %v4206_v47 = vsub.s32 %v185_v10, %v188_v37  ;;  %v288_v57 = vadd.s32 %v287_v51, %v283_v38  ;;  %3945 = vpow2.f32 %v78_v39  ;;  %v44_v46 = vcvt.s32.f32 %v4199_v15 }
  0x3d   :  { %v434_v59 = vand.u32 2147483647, %v4213_v45  ;;  %3947 = vpow2.f32 %v80_v43  ;;  %v45_v61 = vcvt.s32.f32 %v4204_v44  ;;  %v211_v63 = vsub.s32 4, %v187_v32 }
  0x3e   :  { %v191_v55 = vsub.s32 0, %v4206_v47  ;;  %v289_v0 = vadd.s32 536870912, %v288_v57  ;;  %v4227_v2 = vshll.u32 %v339_v48, 8  ;;  %v348_v3 = vshll.u32 %v4051_v54, %v345_v36 }
  0x3f   :  { %v349_v4 = vshrl.u32 %v4052_v56, %v346_v53  ;;  %v351_v5 = vshll.u32 %v4052_v56, %v345_v36  ;;  %v352_v7 = vshrl.u32 %v4053_v58, %v346_v53  ;;  %v354_v21 = vshll.u32 %v4053_v58, %v345_v36 }
  0x40   :  { %v3681_v30 = vmin.u32 %v191_v55, %v4206_v47  ;;  %v4233_v9 = vshrl.u32 %v289_v0, 30  ;;  %v355_v10 = vshrl.u32 %v4054_v60, %v346_v53  ;;  %v181_v11 = vadd.s32 %v4161_v41, %v4158_v40 }
  0x41   :  { %v344_v12 = vshrl.u32 %v343_v35, 5  ;;  %v437_v13 = vand.u32 2139095040, %v4213_v45  ;;  %v4242_v17 = vand.u32 8388607, %v434_v59  ;;  %v212_v19 = vsel %vm127_vm13, %v211_v63, %v187_v32 }
  0x42   :  { %v193_v8 = vclz %v3681_v30  ;;  %v291_v52 = vshll.u32 %v4233_v9, 30  ;;  %v347_v22 = vshrl.u32 %v4051_v54, %v346_v53  ;;  %v350_v23 = vor.u32 %v349_v4, %v348_v3 }
  0x43   :  { %v353_v25 = vor.u32 %v352_v7, %v351_v5  ;;  %v357_v26 = vshll.u32 %v4054_v60, %v345_v36  ;;  %v358_v40 = vshrl.u32 %v4055_v62, %v346_v53  ;;  %v356_v27 = vor.u32 %v355_v10, %v354_v21 }
  0x44   :  { %v3682_v18 = vadd.s32 4294967294, %v193_v8  ;;  %v4250_v41 = vsub.s32 %v288_v57, %v291_v52  ;;  %v360_v31 = vshll.u32 %v4055_v62, %v345_v36  ;;  %v361_v35 = vshrl.u32 %v4056_v6, %v346_v53 }
  0x45   :  { %vm363_vm0 = vcmp.lt.s32.totalorder %v344_v12, 1  ;;  %vm366_vm1 = vcmp.lt.s32.totalorder %v344_v12, 4  ;;  %v214_v48 = vsel %vm4222_vm14, 0, %v212_v19  ;;  %v359_v51 = vor.u32 %v358_v40, %v357_v26 }
  0x46   :  { %vm3683_vm15 = vcmp.lt.s32.totalorder %v3682_v18, 0  ;;  %v4254_v32 = vpop.eup %3945  ;;  %v294_v42 = vsub.s32 0, %v4250_v41  ;;  %v368_v36 = vsel %vm366_vm1, %v356_v27, 2102212464  ;;  %v438_v55 = vshrl.u32 %v437_v13, 23 }
  0x47   :  { %v196_v33 = vsel %vm3683_vm15, 0, %v3682_v18  ;;  %v4258_v43 = vpop.eup %3947  ;;  %vm364_vm2 = vcmp.lt.s32.totalorder %v344_v12, 2  ;;  %vm230_vm3 = vcmp.lt.s32.totalorder %v4103_v20, 0  ;;  %vm365_vm4 = vcmp.lt.s32.totalorder %v344_v12, 3 }
  0x48   :  { %v197_v37 = vsub.s32 32, %v196_v33  ;;  %v198_v38 = vshll.u32 %v4206_v47, %v196_v33  ;;  %v201_v39 = vsub.s32 4294967266, %v196_v33  ;;  %v3685_v30 = vmin.u32 %v294_v42, %v4250_v41 }
  0x49   :  { %v362_v47 = vor.u32 %v361_v35, %v360_v31  ;;  %v367_v63 = vsel %vm363_vm0, %v347_v22, %v350_v23  ;;  %v371_v0 = vsel %vm363_vm0, %v350_v23, %v353_v25  ;;  %v369_v7 = vsel %vm365_vm4, %v353_v25, %v368_v36 }
  0x4a   :  { %v199_v53 = vshrl.u32 %v181_v11, %v197_v37  ;;  %v202_v57 = vadd.s32 127, %v201_v39  ;;  %v296_v5 = vclz %v3685_v30  ;;  %v284_v8 = vadd.s32 %v4188_v28, %v4194_v34 }
  0x4b   :  { %v314_v21 = vsub.s32 4, %v4233_v9  ;;  %v1866_v10 = vadd.s32 3, %v214_v48  ;;  %v372_v11 = vsel %vm366_vm1, %v359_v51, 920167782  ;;  %vm4274_vm5 = vcmp.le.f32.partialorder %v228_v29, 0.7853982 }
  0x4c   :  { %v200_v3 = vor.u32 %v199_v53, %v198_v38  ;;  %v203_v4 = vshll.u32 %v202_v57, 23  ;;  %v3686_v52 = vadd.s32 4294967294, %v296_v5  ;;  %v373_v22 = vsel %vm365_vm4, %v356_v27, %v372_v11 }
  0x4d   :  { %v370_v23 = vsel %vm364_vm2, %v367_v63, %v369_v7  ;;  %v374_v28 = vsel %vm364_vm2, %v371_v0, %v373_v22  ;;  %v375_v34 = vsel %vm363_vm0, %v353_v25, %v356_v27  ;;  %v376_v26 = vsel %vm366_vm1, %v362_v47, 1326507024 }
  0x4e   :  { %v204_v13 = vor.u32 4788187, %v203_v4  ;;  %v207_v18 = vcvt.s32.f32 %v200_v3  ;;  %vm3687_vm6 = vcmp.lt.s32.totalorder %v3686_v52, 0  ;;  %v377_v31 = vsel %vm365_vm4, %v359_v51, %v376_v26 }
  0x4f   :  { %v3692_v33 = vadd.s32 4294967169, %v438_v55  ;;  %v299_v29 = vsel %vm3687_vm6, 0, %v3686_v52  ;;  %v378_v35 = vsel %vm364_vm2, %v375_v34, %v377_v31  ;;  %v442_v51 = vor.u32 8388608, %v4242_v17 }
  0x50   :  { %v205_v40 = vand.u32 2147483647, %v204_v13  ;;  %v4286_v37 = vmul.u32.u64.low %v4227_v2, %v374_v28  ;;  %v4287_v38 = vmul.u32.u64.high %v4227_v2, %v374_v28, %v4286_v37  ;;  %v300_v42 = vsub.s32 32, %v299_v29 }
  0x51   :  { %v301_v36 = vshll.u32 %v4250_v41, %v299_v29  ;;  %v304_v25 = vsub.s32 4294967266, %v299_v29  ;;  %v4292_v27 = vmul.u32.u64.low %v4227_v2, %v378_v35  ;;  %v4293_v53 = vmul.u32.u64.high %v4227_v2, %v378_v35, %v4292_v27 }
  0x52   :  { %v208_v39 = vmul.f32 %v207_v18, %v205_v40  ;;  %v444_v55 = vadd.s32 1, %v3692_v33  ;;  %v302_v12 = vshrl.u32 %v284_v8, %v300_v42  ;;  %v315_v47 = vsel %vm230_vm3, %v314_v21, %v4233_v9 }
  0x53   :  { %v305_v30 = vadd.s32 127, %v304_v25  ;;  %v4299_v63 = vand.u32 3, %v1866_v10  ;;  %v386_v0 = vmul.u32 %v4227_v2, %v370_v23  ;;  %v389_v41 = vadd.s32 1, %v4287_v38 }
  0x54   :  { %v209_v57 = vxor.u32 2147483648, %v208_v39  ;;  %vm445_vm7 = vcmp.gt.s32.totalorder %v444_v55, 0  ;;  %v303_v4 = vor.u32 %v302_v12, %v301_v36  ;;  %v317_v9 = vsel %vm4274_vm5, 0, %v315_v47 }
  0x55   :  { %v306_v17 = vshll.u32 %v305_v30, 23  ;;  %v446_v5 = vsel %vm445_vm7, %v444_v55, 0  ;;  %v4310_v8 = vand.u32 3, %v214_v48  ;;  %vm388_vm8 = vc.u32 %v4293_v53, %v4286_v37 }
  0x56   :  { %v210_v3 = vsel %vm127_vm13, %v209_v57, %v208_v39  ;;  %v310_v21 = vcvt.s32.f32 %v303_v4  ;;  %v390_v10 = vsel %vm388_vm8, %v389_v41, %v4287_v38  ;;  %v448_v13 = vand.u32 31, %v446_v5 }
  0x57   :  { %v213_v7 = vsel %vm4222_vm14, %v4100_v16, %v210_v3  ;;  %v307_v2 = vor.u32 4788187, %v306_v17  ;;  %v391_v11 = vadd.s32 %v390_v10, %v386_v0  ;;  %v4317_v50 = vmul.f32 %v4254_v32, %v4097_v14 }
  0x58   :  { %3949 = vcosq.f32 %v213_v7  ;;  %vm1872_vm9 = vcmp.eq.s32.totalorder %v4299_v63, 2  ;;  %v1970_v48 = vadd.s32 3, %v317_v9  ;;  %v4320_v52 = vand.u32 3, %v317_v9 }
  0x59   :  { %3951 = vsinq.f32 %v213_v7  ;;  %v308_v18 = vand.u32 2147483647, %v307_v2  ;;  %vm1869_vm10 = vcmp.eq.s32.totalorder %v4299_v63, 0  ;;  %vm220_vm11 = vcmp.eq.s32.totalorder %v4310_v8, 0 }
  0x5a   :  { %vm223_vm12 = vcmp.eq.s32.totalorder %v4310_v8, 2  ;;  %v392_v22 = vadd.s32 536870912, %v391_v11  ;;  %v4325_v23 = vshrl.u32 %v446_v5, 5  ;;  %v449_v28 = vsub.s32 32, %v448_v13 }
  0x5b   :  { %v451_v34 = vshll.u32 %v4051_v54, %v448_v13  ;;  %v311_v32 = vmul.f32 %v310_v21, %v308_v18  ;;  %v454_v26 = vshll.u32 %v4052_v56, %v448_v13  ;;  %v457_v40 = vshll.u32 %v4053_v58, %v448_v13 }
  0x5c   :  { %v460_v31 = vshll.u32 %v4054_v60, %v448_v13  ;;  %vm1868_vm13 = vcmp.lt.s32.totalorder %v4299_v63, 2  ;;  %v4332_v33 = vshrl.u32 %v392_v22, 30  ;;  %v452_v29 = vshrl.u32 %v4052_v56, %v449_v28 }
  0x5d   :  { %v455_v35 = vshrl.u32 %v4053_v58, %v449_v28  ;;  %v463_v38 = vshll.u32 %v4055_v62, %v448_v13  ;;  %v312_v39 = vxor.u32 2147483648, %v311_v32  ;;  %vm219_vm14 = vcmp.lt.s32.totalorder %v4310_v8, 2 }
  0x5e   :  { %v458_v42 = vshrl.u32 %v4054_v60, %v449_v28  ;;  %v461_v36 = vshrl.u32 %v4055_v62, %v449_v28  ;;  %v464_v25 = vshrl.u32 %v4056_v6, %v449_v28  ;;  %v4341_v27 = vand.u32 3, %v1970_v48 }
  0x5f   :  { %v394_v55 = vshll.u32 %v4332_v33, 30  ;;  %vm466_vm15 = vcmp.lt.s32.totalorder %v4325_v23, 1  ;;  %v4345_v57 = vshll.u32 %v442_v51, 8  ;;  %v313_v12 = vsel %vm230_vm3, %v312_v39, %v311_v32 }
  0x60   :  { %v453_v30 = vor.u32 %v452_v29, %v451_v34  ;;  %v456_v47 = vor.u32 %v455_v35, %v454_v26  ;;  %v462_v0 = vor.u32 %v461_v36, %v460_v31  ;;  %vm217_vm0 = vweird.f32 %v4100_v16 }
  0x61   :  { %v316_v41 = vsel %vm4274_vm5, %v4103_v20, %v313_v12  ;;  %v4353_v3 = vsub.s32 %v391_v11, %v394_v55  ;;  %v459_v4 = vor.u32 %v458_v42, %v457_v40  ;;  %vm469_vm1 = vcmp.lt.s32.totalorder %v4325_v23, 4 }
  0x62   :  { %v3950_v17 = vpop.eup %3949  ;;  %3953 = vcosq.f32 %v316_v41  ;;  %v465_v51 = vor.u32 %v464_v25, %v463_v38  ;;  %vm467_vm2 = vcmp.lt.s32.totalorder %v4325_v23, 2  ;;  %vm468_vm3 = vcmp.lt.s32.totalorder %v4325_v23, 3 }
  0x63   :  { %v3952_v5 = vpop.eup %3951  ;;  %v224_v7 = vxor.u32 2147483648, %v3950_v17  ;;  %3955 = vsinq.f32 %v316_v41  ;;  %v397_v9 = vsub.s32 0, %v4353_v3  ;;  %v450_v19 = vshrl.u32 %v4051_v54, %v449_v28 }
  0x64   :  { %v221_v2 = vxor.u32 2147483648, %v3952_v5  ;;  %v471_v21 = vsel %vm469_vm1, %v459_v4, 2102212464  ;;  %v474_v10 = vsel %vm466_vm15, %v453_v30, %v456_v47  ;;  %v475_v11 = vsel %vm469_vm1, %v462_v0, 920167782 }
  0x65   :  { %v1874_v13 = vsel %vm1872_vm9, %v224_v7, %v3952_v5  ;;  %vm323_vm4 = vcmp.eq.s32.totalorder %v4320_v52, 0  ;;  %v3689_v18 = vmin.u32 %v397_v9, %v4353_v3  ;;  %v476_v48 = vsel %vm468_vm3, %v459_v4, %v475_v11 }
  0x66   :  { %v478_v22 = vsel %vm466_vm15, %v456_v47, %v459_v4  ;;  %v1871_v28 = vsel %vm1869_vm10, %v3950_v17, %v221_v2  ;;  %v222_v34 = vsel %vm220_vm11, %v3950_v17, %v221_v2  ;;  %v225_v32 = vsel %vm223_vm12, %v224_v7, %v3952_v5 }
  0x67   :  { %vm322_vm5 = vcmp.lt.s32.totalorder %v4320_v52, 2  ;;  %v479_v26 = vsel %vm469_vm1, %v465_v51, 1326507024  ;;  %vm320_vm6 = vweird.f32 %v4103_v20  ;;  %vm326_vm7 = vcmp.eq.s32.totalorder %v4320_v52, 2 }
  0x68   :  { %v399_v40 = vclz %v3689_v18  ;;  %v477_v31 = vsel %vm467_vm2, %v474_v10, %v476_v48  ;;  %v480_v29 = vsel %vm468_vm3, %v462_v0, %v479_v26  ;;  %v1875_v35 = vsel %vm1868_vm13, %v1871_v28, %v1874_v13 }
  0x69   :  { %v470_v38 = vsel %vm466_vm15, %v450_v19, %v453_v30  ;;  %v472_v39 = vsel %vm468_vm3, %v456_v47, %v471_v21  ;;  %v481_v42 = vsel %vm467_vm2, %v478_v22, %v480_v29  ;;  %v226_v36 = vsel %vm219_vm14, %v222_v34, %v225_v32 }
  0x6a   :  { %v3690_v25 = vadd.s32 4294967294, %v399_v40  ;;  %v4400_v55 = vmul.u32.u64.low %v4345_v57, %v481_v42  ;;  %v4401_v12 = vmul.u32.u64.high %v4345_v57, %v481_v42, %v4400_v55  ;;  %vm1972_vm8 = vcmp.lt.s32.totalorder %v4341_v27, 2 }
  0x6b   :  { %vm1973_vm9 = vcmp.eq.s32.totalorder %v4341_v27, 0  ;;  %v4406_v63 = vmul.u32.u64.low %v4345_v57, %v477_v31  ;;  %v4407_v30 = vmul.u32.u64.high %v4345_v57, %v477_v31, %v4406_v63  ;;  %vm1976_vm10 = vcmp.eq.s32.totalorder %v4341_v27, 2 }
  0x6c   :  { %vm333_vm11 = vcmp.lt.s32.totalorder %v4109_v24, 0  ;;  %v387_v8 = vadd.s32 %v4286_v37, %v4293_v53  ;;  %vm3691_vm12 = vcmp.lt.s32.totalorder %v3690_v25, 0  ;;  %v473_v47 = vsel %vm467_vm2, %v470_v38, %v472_v39  ;;  %v3954_v0 = vpop.eup %3953 }
  0x6d   :  { %v1876_v41 = vsel %vm217_vm0, nan, %v1875_v35  ;;  %v227_v4 = vsel %vm217_vm0, nan, %v226_v36  ;;  %v402_v17 = vsel %vm3691_vm12, 0, %v3690_v25  ;;  %v417_v51 = vsub.s32 4, %v4332_v33  ;;  %v3956_v5 = vpop.eup %3955 }
  0x6e   :  { %v327_v7 = vxor.u32 2147483648, %v3954_v0  ;;  %v403_v9 = vsub.s32 32, %v402_v17  ;;  %v404_v19 = vshll.u32 %v4353_v3, %v402_v17  ;;  %v407_v37 = vsub.s32 4294967266, %v402_v17 }
  0x6f   :  { %v324_v53 = vxor.u32 2147483648, %v3956_v5  ;;  %v489_v23 = vmul.u32 %v4345_v57, %v473_v47  ;;  %vm491_vm13 = vc.u32 %v4401_v12, %v4406_v63  ;;  %v492_v2 = vadd.s32 1, %v4407_v30 }
  0x70   :  { %v1978_v16 = vsel %vm1976_vm10, %v327_v7, %v3956_v5  ;;  %v328_v21 = vsel %vm326_vm7, %v327_v7, %v3956_v5  ;;  %v405_v10 = vshrl.u32 %v387_v8, %v403_v9  ;;  %v408_v11 = vadd.s32 127, %v407_v37 }
  0x71   :  { %v1975_v3 = vsel %vm1973_vm9, %v3954_v0, %v324_v53  ;;  %v325_v13 = vsel %vm323_vm4, %v3954_v0, %v324_v53  ;;  %v493_v57 = vsel %vm491_vm13, %v492_v2, %v4407_v30  ;;  %v540_v18 = vand.u32 2139095040, %v4317_v50 }
  0x72   :  { %v1979_v48 = vsel %vm1972_vm8, %v1975_v3, %v1978_v16  ;;  %v329_v22 = vsel %vm322_vm5, %v325_v13, %v328_v21  ;;  %v406_v28 = vor.u32 %v405_v10, %v404_v19  ;;  %v409_v34 = vshll.u32 %v408_v11, 23 }
  0x73   :  { %v1980_v32 = vsel %vm320_vm6, nan, %v1979_v48  ;;  %v330_v26 = vsel %vm320_vm6, nan, %v329_v22  ;;  %v494_v40 = vadd.s32 %v493_v57, %v489_v23  ;;  %v537_v31 = vand.u32 2147483647, %v4317_v50 }
  0x74   :  { %v3449_v29 = vpack.c.bf16 %v1980_v32, %v1876_v41  ;;  %v3441_v35 = vpack.c.bf16 %v330_v26, %v227_v4  ;;  %v410_v38 = vor.u32 4788187, %v409_v34  ;;  %v413_v39 = vcvt.s32.f32 %v406_v28 }
  0x75   :  { %v418_v52 = vsel %vm333_vm11, %v417_v51, %v4332_v33  ;;  %v495_v27 = vadd.s32 536870912, %v494_v40  ;;  %v541_v42 = vshrl.u32 %v540_v18, 23  ;;  %v60_v36 = vmul.f32 -0.071955785, %v44_v46 }
  0x76   :  { %3816 = vmatprep.subr.bf16.mxu0 %v3449_v29  ;;  %v411_v25 = vand.u32 2147483647, %v410_v38  ;;  %v61_v20 = vmul.f32 -0.071955785, %v45_v61  ;;  %vm4454_vm14 = vcmp.le.f32.partialorder %v331_v49, 0.7853982  ;;  %v4464_v44 = vmul.f32 %v4258_v43, %v4097_v14 }
  0x77   :  { %3817 = vmatpush3.bf16.msra.mxu0 %v3441_v35  ;;  %v496_v30 = vshrl.u32 %v495_v27, 30  ;;  %v3696_v8 = vadd.s32 4294967169, %v541_v42  ;;  %v420_v47 = vsel %vm4454_vm14, 0, %v418_v52  ;;  %v544_v15 = vand.u32 8388607, %v537_v31 }
  0x78   :  { %v414_v33 = vmul.f32 %v413_v39, %v411_v25  ;;  %v82_v0 = vmul.f32 1.442695, %v60_v36  ;;  %v84_v41 = vmul.f32 1.442695, %v61_v20  ;;  %v2074_v17 = vadd.s32 3, %v420_v47 }
  0x79   :  { %v497_v46 = vshll.u32 %v496_v30, 30  ;;  %v547_v61 = vadd.s32 1, %v3696_v8  ;;  %v545_v5 = vor.u32 8388608, %v544_v15  ;;  %v643_v19 = vand.u32 2139095040, %v4464_v44 }
  0x7a   :  { %v415_v49 = vxor.u32 2147483648, %v414_v33  ;;  %3957 = vpow2.f32 %v82_v0  ;;  %vm436_vm0 = vcmp.lt.s32.totalorder %v4213_v45, 0  ;;  %v4476_v37 = vand.u32 3, %v420_v47 }
  0x7b   :  { %v4466_v4 = vsub.s32 %v494_v40, %v497_v46  ;;  %vm548_vm15 = vcmp.gt.s32.totalorder %v547_v61, 0  ;;  %3959 = vpow2.f32 %v84_v41  ;;  %vm4480_vm1 = vcmp.le.f32.partialorder %v434_v59, 0.7853982 }
  0x7c   :  { %v416_v51 = vsel %vm333_vm11, %v415_v49, %v414_v33  ;;  %v549_v7 = vsel %vm548_vm15, %v547_v61, 0  ;;  %v490_v2 = vadd.s32 %v4406_v63, %v4401_v12  ;;  %v4487_v21 = vand.u32 3, %v2074_v17 }
  0x7d   :  { %v419_v9 = vsel %vm4454_vm14, %v4109_v24, %v416_v51  ;;  %v500_v43 = vsub.s32 0, %v4466_v4  ;;  %v551_v53 = vand.u32 31, %v549_v7  ;;  %v640_v10 = vand.u32 2147483647, %v4464_v44 }
  0x7e   :  { %3961 = vcosq.f32 %v419_v9  ;;  %v520_v11 = vsub.s32 4, %v496_v30  ;;  %v4490_v13 = vshll.u32 %v545_v5, 8  ;;  %v644_v18 = vshrl.u32 %v643_v19, 23 }
  0x7f   :  { %v3693_v16 = vmin.u32 %v500_v43, %v4466_v4  ;;  %v552_v3 = vsub.s32 32, %v551_v53  ;;  %3963 = vsinq.f32 %v419_v9  ;;  %v554_v59 = vshll.u32 %v4051_v54, %v551_v53 }
  0x80   :  { %v4493_v48 = vshrl.u32 %v549_v7, 5  ;;  %v557_v63 = vshll.u32 %v4052_v56, %v551_v53  ;;  %v560_v34 = vshll.u32 %v4053_v58, %v551_v53  ;;  %v563_v26 = vshll.u32 %v4054_v60, %v551_v53 }
  0x81   :  { %v502_v57 = vclz %v3693_v16  ;;  %v555_v12 = vshrl.u32 %v4052_v56, %v552_v3  ;;  %v558_v22 = vshrl.u32 %v4053_v58, %v552_v3  ;;  %v561_v32 = vshrl.u32 %v4054_v60, %v552_v3 }
  0x82   :  { %v521_v40 = vsel %vm436_vm0, %v520_v11, %v496_v30  ;;  %v553_v29 = vshrl.u32 %v4051_v54, %v552_v3  ;;  %v564_v35 = vshrl.u32 %v4055_v62, %v552_v3  ;;  %v566_v38 = vshll.u32 %v4055_v62, %v551_v53 }
  0x83   :  { %v3694_v28 = vadd.s32 4294967294, %v502_v57  ;;  %v556_v39 = vor.u32 %v555_v12, %v554_v59  ;;  %v559_v52 = vor.u32 %v558_v22, %v557_v63  ;;  %v567_v27 = vshrl.u32 %v4056_v6, %v552_v3 }
  0x84   :  { %v562_v36 = vor.u32 %v561_v32, %v560_v34  ;;  %v565_v25 = vor.u32 %v564_v35, %v563_v26  ;;  %vm569_vm3 = vcmp.lt.s32.totalorder %v4493_v48, 1  ;;  %v3958_v20 = vpop.eup %3957  ;;  %vm2080_vm4 = vcmp.eq.s32.totalorder %v4487_v21, 2 }
  0x85   :  { %vm3695_vm2 = vcmp.lt.s32.totalorder %v3694_v28, 0  ;;  %v568_v33 = vor.u32 %v567_v27, %v566_v38  ;;  %v4510_v47 = vpop.eup %3959  ;;  %v523_v15 = vsel %vm4480_vm1, 0, %v521_v40  ;;  %vm2077_vm5 = vcmp.eq.s32.totalorder %v4487_v21, 0 }
  0x86   :  { %v505_v42 = vsel %vm3695_vm2, 0, %v3694_v28  ;;  %vm429_vm6 = vcmp.eq.s32.totalorder %v4476_v37, 2  ;;  %vm572_vm7 = vcmp.lt.s32.totalorder %v4493_v48, 4  ;;  %v3700_v46 = vadd.s32 4294967169, %v644_v18 }
  0x87   :  { %v506_v55 = vsub.s32 32, %v505_v42  ;;  %v507_v30 = vshll.u32 %v4466_v4, %v505_v42  ;;  %v510_v8 = vsub.s32 4294967266, %v505_v42  ;;  %v647_v61 = vand.u32 8388607, %v640_v10 }
  0x88   :  { %vm571_vm8 = vcmp.lt.s32.totalorder %v4493_v48, 3  ;;  %v574_v41 = vsel %vm572_vm7, %v562_v36, 2102212464  ;;  %v4522_v4 = vpop.eup %3961  ;;  %vm570_vm9 = vcmp.lt.s32.totalorder %v4493_v48, 2  ;;  %v573_v17 = vsel %vm569_vm3, %v553_v29, %v556_v39 }
  0x89   :  { %v508_v0 = vshrl.u32 %v490_v2, %v506_v55  ;;  %v511_v49 = vadd.s32 127, %v510_v8  ;;  %v577_v51 = vsel %vm569_vm3, %v556_v39, %v559_v52  ;;  %v578_v5 = vsel %vm572_vm7, %v565_v25, 920167782  ;;  %v4531_v7 = vpop.eup %3963 }
  0x8a   :  { %v575_v19 = vsel %vm571_vm8, %v559_v52, %v574_v41  ;;  %v582_v53 = vsel %vm572_vm7, %v568_v33, 1326507024  ;;  %v579_v2 = vsel %vm571_vm8, %v562_v36, %v578_v5  ;;  %v581_v16 = vsel %vm569_vm3, %v559_v52, %v562_v36 }
  0x8b   :  { %v509_v9 = vor.u32 %v508_v0, %v507_v30  ;;  %v512_v43 = vshll.u32 %v511_v49, 23  ;;  %v648_v11 = vor.u32 8388608, %v647_v61  ;;  %v650_v3 = vadd.s32 1, %v3700_v46 }
  0x8c   :  { %v430_v57 = vxor.u32 2147483648, %v4522_v4  ;;  %v2178_v12 = vadd.s32 3, %v523_v15  ;;  %v427_v63 = vxor.u32 2147483648, %v4531_v7  ;;  %v576_v22 = vsel %vm570_vm9, %v573_v17, %v575_v19 }
  0x8d   :  { %v513_v59 = vor.u32 4788187, %v512_v43  ;;  %v516_v18 = vcvt.s32.f32 %v509_v9  ;;  %v580_v28 = vsel %vm570_vm9, %v577_v51, %v579_v2  ;;  %v583_v34 = vsel %vm571_vm8, %v565_v25, %v582_v53 }
  0x8e   :  { %vm426_vm10 = vcmp.eq.s32.totalorder %v4476_v37, 0  ;;  %v584_v26 = vsel %vm570_vm9, %v581_v16, %v583_v34  ;;  %v4553_v40 = vmul.u32.u64.low %v4490_v13, %v580_v28  ;;  %v4554_v29 = vmul.u32.u64.high %v4490_v13, %v580_v28, %v4553_v40 }
  0x8f   :  { %v514_v32 = vand.u32 2147483647, %v513_v59  ;;  %v4558_v35 = vmul.u32.u64.low %v4490_v13, %v584_v26  ;;  %v4559_v38 = vmul.u32.u64.high %v4490_v13, %v584_v26, %v4558_v35  ;;  %vm651_vm11 = vcmp.gt.s32.totalorder %v650_v3, 0 }
  0x90   :  { %v4562_v39 = vmul.f32 %v3958_v20, %v4097_v14  ;;  %v4564_v27 = vand.u32 3, %v523_v15  ;;  %v652_v42 = vsel %vm651_vm11, %v650_v3, 0  ;;  %v4566_v36 = vshll.u32 %v648_v11, 8 }
  0x91   :  { %v517_v52 = vmul.f32 %v516_v18, %v514_v32  ;;  %v2082_v48 = vsel %vm2080_vm4, %v430_v57, %v4531_v7  ;;  %v4571_v25 = vand.u32 3, %v2178_v12  ;;  %v592_v55 = vmul.u32 %v4490_v13, %v576_v22 }
  0x92   :  { %v654_v30 = vand.u32 31, %v652_v42  ;;  %vm2076_vm12 = vcmp.lt.s32.totalorder %v4487_v21, 2  ;;  %v2079_v14 = vsel %vm2077_vm5, %v4522_v4, %v427_v63  ;;  %vm425_vm13 = vcmp.lt.s32.totalorder %v4476_v37, 2 }
  0x93   :  { %v518_v8 = vxor.u32 2147483648, %v517_v52  ;;  %v431_v20 = vsel %vm429_vm6, %v430_v57, %v4531_v7  ;;  %v595_v33 = vadd.s32 1, %v4554_v29  ;;  %vm594_vm14 = vc.u32 %v4559_v38, %v4553_v40 }
  0x94   :  { %v653_v13 = vshrl.u32 %v652_v42, 5  ;;  %v655_v15 = vsub.s32 32, %v654_v30  ;;  %v657_v46 = vshll.u32 %v4051_v54, %v654_v30  ;;  %v660_v49 = vshll.u32 %v4052_v56, %v654_v30 }
  0x95   :  { %v519_v61 = vsel %vm436_vm0, %v518_v8, %v517_v52  ;;  %v596_v0 = vsel %vm594_vm14, %v595_v33, %v4554_v29  ;;  %v663_v41 = vshll.u32 %v4053_v58, %v654_v30  ;;  %vm423_vm15 = vweird.f32 %v4109_v24 }
  0x96   :  { %v522_v17 = vsel %vm4480_vm1, %v4213_v45, %v519_v61  ;;  %v597_v51 = vadd.s32 %v596_v0, %v592_v55  ;;  %v656_v5 = vshrl.u32 %v4051_v54, %v655_v15  ;;  %v658_v7 = vshrl.u32 %v4052_v56, %v655_v15 }
  0x97   :  { %3965 = vcosq.f32 %v522_v17  ;;  %v661_v9 = vshrl.u32 %v4053_v58, %v655_v15  ;;  %v664_v43 = vshrl.u32 %v4054_v60, %v655_v15  ;;  %v666_v19 = vshll.u32 %v4054_v60, %v654_v30 }
  0x98   :  { %3967 = vsinq.f32 %v522_v17  ;;  %v598_v53 = vadd.s32 536870912, %v597_v51  ;;  %v659_v2 = vor.u32 %v658_v7, %v657_v46  ;;  %v667_v23 = vshrl.u32 %v4055_v62, %v655_v15 }
  0x99   :  { %vm532_vm0 = vcmp.eq.s32.totalorder %v4564_v27, 2  ;;  %v662_v16 = vor.u32 %v661_v9, %v660_v49  ;;  %v665_v11 = vor.u32 %v664_v43, %v663_v41  ;;  %v669_v3 = vshll.u32 %v4055_v62, %v654_v30 }
  0x9a   :  { %v670_v57 = vshrl.u32 %v4056_v6, %v655_v15  ;;  %v428_v59 = vsel %vm426_vm10, %v4522_v4, %v427_v63  ;;  %vm529_vm1 = vcmp.eq.s32.totalorder %v4564_v27, 0  ;;  %vm539_vm2 = vcmp.lt.s32.totalorder %v4317_v50, 0 }
  0x9b   :  { %v599_v18 = vshrl.u32 %v598_v53, 30  ;;  %v668_v12 = vor.u32 %v667_v23, %v666_v19  ;;  %vm672_vm3 = vcmp.lt.s32.totalorder %v653_v13, 1  ;;  %vm2180_vm4 = vcmp.lt.s32.totalorder %v4571_v25, 2 }
  0x9c   :  { %vm528_vm5 = vcmp.lt.s32.totalorder %v4564_v27, 2  ;;  %v671_v22 = vor.u32 %v670_v57, %v669_v3  ;;  %vm673_vm6 = vcmp.lt.s32.totalorder %v653_v13, 2  ;;  %vm674_vm7 = vcmp.lt.s32.totalorder %v653_v13, 3 }
  0x9d   :  { %vm675_vm8 = vcmp.lt.s32.totalorder %v653_v13, 4  ;;  %vm526_vm9 = vweird.f32 %v4213_v45  ;;  %v600_v28 = vshll.u32 %v599_v18, 30  ;;  %v676_v34 = vsel %vm672_vm3, %v656_v5, %v659_v2 }
  0x9e   :  { %v677_v4 = vsel %vm675_vm8, %v665_v11, 2102212464  ;;  %v680_v63 = vsel %vm672_vm3, %v659_v2, %v662_v16  ;;  %v681_v26 = vsel %vm675_vm8, %v668_v12, 920167782  ;;  %v684_v29 = vsel %vm672_vm3, %v662_v16, %v665_v11 }
  0x9f   :  { %v678_v32 = vsel %vm674_vm7, %v662_v16, %v677_v4  ;;  %v685_v35 = vsel %vm675_vm8, %v671_v22, 1326507024  ;;  %v2083_v52 = vsel %vm2076_vm12, %v2079_v14, %v2082_v48  ;;  %v432_v42 = vsel %vm425_vm13, %v428_v59, %v431_v20 }
  0xa0   :  { %v4617_v55 = vsub.s32 %v597_v51, %v600_v28  ;;  %v682_v30 = vsel %vm674_vm7, %v665_v11, %v681_v26  ;;  %v623_v8 = vsub.s32 4, %v599_v18  ;;  %v679_v33 = vsel %vm673_vm6, %v676_v34, %v678_v32 }
  0xa1   :  { %v683_v15 = vsel %vm673_vm6, %v680_v63, %v682_v30  ;;  %v686_v46 = vsel %vm674_vm7, %v668_v12, %v685_v35  ;;  %vm4625_vm10 = vcmp.le.f32.partialorder %v537_v31, 0.7853982  ;;  %v3966_v20 = vpop.eup %3965  ;;  %vm2184_vm11 = vcmp.eq.s32.totalorder %v4571_v25, 2 }
  0xa2   :  { %v603_v37 = vsub.s32 0, %v4617_v55  ;;  %v687_v21 = vsel %vm673_vm6, %v684_v29, %v686_v46  ;;  %v4632_v48 = vmul.u32.u64.low %v4566_v36, %v683_v15  ;;  %v4633_v14 = vmul.u32.u64.high %v4566_v36, %v683_v15, %v4632_v48  ;;  %v3968_v41 = vpop.eup %3967 }
  0xa3   :  { %v4638_v0 = vmul.u32.u64.low %v4566_v36, %v687_v21  ;;  %v4639_v49 = vmul.u32.u64.high %v4566_v36, %v687_v21, %v4638_v0  ;;  %v746_v31 = vand.u32 2139095040, %v4562_v39  ;;  %v533_v17 = vxor.u32 2147483648, %v3966_v20 }
  0xa4   :  { %v2084_v13 = vsel %vm423_vm15, nan, %v2083_v52  ;;  %vm2181_vm12 = vcmp.eq.s32.totalorder %v4571_v25, 0  ;;  %v3697_v51 = vmin.u32 %v603_v37, %v4617_v55  ;;  %v530_v5 = vxor.u32 2147483648, %v3968_v41 }
  0xa5   :  { %v433_v7 = vsel %vm423_vm15, nan, %v432_v42  ;;  %v624_v9 = vsel %vm539_vm2, %v623_v8, %v599_v18  ;;  %v695_v43 = vmul.u32 %v4566_v36, %v679_v33  ;;  %v2186_v19 = vsel %vm2184_vm11, %v533_v17, %v3968_v41 }
  0xa6   :  { %v534_v53 = vsel %vm532_vm0, %v533_v17, %v3968_v41  ;;  %v605_v2 = vclz %v3697_v51  ;;  %v698_v23 = vadd.s32 1, %v4633_v14  ;;  %v2183_v16 = vsel %vm2181_vm12, %v3966_v20, %v530_v5 }
  0xa7   :  { %v531_v11 = vsel %vm529_vm1, %v3966_v20, %v530_v5  ;;  %vm697_vm13 = vc.u32 %v4639_v49, %v4632_v48  ;;  %v747_v24 = vshrl.u32 %v746_v31, 23  ;;  %v2187_v3 = vsel %vm2180_vm4, %v2183_v16, %v2186_v19 }
  0xa8   :  { %v535_v36 = vsel %vm528_vm5, %v531_v11, %v534_v53  ;;  %v3698_v57 = vadd.s32 4294967294, %v605_v2  ;;  %v699_v59 = vsel %vm697_vm13, %v698_v23, %v4633_v14  ;;  %v2188_v18 = vsel %vm526_vm9, nan, %v2187_v3 }
  0xa9   :  { %v536_v12 = vsel %vm526_vm9, nan, %v535_v36  ;;  %v700_v22 = vadd.s32 %v699_v59, %v695_v43  ;;  %v743_v28 = vand.u32 2147483647, %v4562_v39  ;;  %v3450_v34 = vpack.c.bf16 %v2188_v18, %v2084_v13 }
  0xaa   :  { %v3442_v4 = vpack.c.bf16 %v536_v12, %v433_v7  ;;  %v593_v25 = vadd.s32 %v4553_v40, %v4559_v38  ;;  %vm3699_vm14 = vcmp.lt.s32.totalorder %v3698_v57, 0  ;;  %v626_v63 = vsel %vm4625_vm10, 0, %v624_v9  ;;  %v4678_v40 = vld [vmem:[%s5945_s0] ss:$0 sm:$0xff] }
  0xab   :  { %v608_v27 = vsel %vm3699_vm14, 0, %v3698_v57  ;;  %v701_v32 = vadd.s32 536870912, %v700_v22  ;;  %3818 = vmatprep.subr.bf16.mxu0 %v3450_v34  ;;  %v3704_v35 = vadd.s32 4294967169, %v747_v24  ;;  %v750_v42 = vand.u32 8388607, %v743_v28 }
  0xac   :  { %v609_v26 = vsub.s32 32, %v608_v27  ;;  %v610_v29 = vshll.u32 %v4617_v55, %v608_v27  ;;  %v613_v45 = vsub.s32 4294967266, %v608_v27  ;;  %3819 = vmatpush3.bf16.msra.mxu0 %v3442_v4  ;;  %v4682_v38 = vmul.f32 %v4678_v40, %v4510_v47 }
  0xad   :  { %v702_v52 = vshrl.u32 %v701_v32, 30  ;;  %v753_v33 = vadd.s32 1, %v3704_v35  ;;  %v2282_v15 = vadd.s32 3, %v626_v63  ;;  %v751_v20 = vor.u32 8388608, %v750_v42 }
  0xae   :  { %v611_v30 = vshrl.u32 %v593_v25, %v609_v26  ;;  %v614_v8 = vadd.s32 127, %v613_v45  ;;  %v846_v31 = vand.u32 2147483647, %v4682_v38  ;;  %vm642_vm0 = vcmp.lt.s32.totalorder %v4464_v44, 0 }
  0xaf   :  { %v703_v55 = vshll.u32 %v702_v52, 30  ;;  %v726_v21 = vsub.s32 4, %v702_v52  ;;  %vm754_vm15 = vcmp.gt.s32.totalorder %v753_v33, 0  ;;  %v849_v47 = vand.u32 2139095040, %v4682_v38 }
  0xb0   :  { %v612_v46 = vor.u32 %v611_v30, %v610_v29  ;;  %v615_v37 = vshll.u32 %v614_v8, 23  ;;  %v755_v0 = vsel %vm754_vm15, %v753_v33, 0  ;;  %vm4691_vm1 = vcmp.le.f32.partialorder %v640_v10, 0.7853982 }
  0xb1   :  { %v4684_v14 = vsub.s32 %v700_v22, %v703_v55  ;;  %v4696_v5 = vshrl.u32 %v755_v0, 5  ;;  %v757_v7 = vand.u32 31, %v755_v0  ;;  %v727_v43 = vsel %vm642_vm0, %v726_v21, %v702_v52 }
  0xb2   :  { %v616_v41 = vor.u32 4788187, %v615_v37  ;;  %v619_v17 = vcvt.s32.f32 %v612_v46  ;;  %v4700_v19 = vand.u32 3, %v2282_v15  ;;  %v4702_v53 = vand.u32 3, %v626_v63 }
  0xb3   :  { %v706_v51 = vsub.s32 0, %v4684_v14  ;;  %v696_v2 = vadd.s32 %v4632_v48, %v4639_v49  ;;  %v4707_v23 = vshll.u32 %v751_v20, 8  ;;  %v4711_v16 = vand.u32 8388607, %v846_v31 }
  0xb4   :  { %v617_v9 = vand.u32 2147483647, %v616_v41  ;;  %v758_v24 = vsub.s32 32, %v757_v7  ;;  %v760_v3 = vshll.u32 %v4051_v54, %v757_v7  ;;  %v850_v36 = vshrl.u32 %v849_v47, 23 }
  0xb5   :  { %v3701_v10 = vmin.u32 %v706_v51, %v4684_v14  ;;  %v4716_v59 = vsel %vm4691_vm1, 0, %v727_v43  ;;  %vm775_vm3 = vcmp.lt.s32.totalorder %v4696_v5, 1  ;;  %vm777_vm4 = vcmp.lt.s32.totalorder %v4696_v5, 3 }
  0xb6   :  { %v620_v11 = vmul.f32 %v619_v17, %v617_v9  ;;  %v759_v49 = vshrl.u32 %v4051_v54, %v758_v24  ;;  %v761_v18 = vshrl.u32 %v4052_v56, %v758_v24  ;;  %v763_v12 = vshll.u32 %v4052_v56, %v757_v7 }
  0xb7   :  { %v708_v57 = vclz %v3701_v10  ;;  %v764_v34 = vshrl.u32 %v4053_v58, %v758_v24  ;;  %v766_v4 = vshll.u32 %v4053_v58, %v757_v7  ;;  %v767_v25 = vshrl.u32 %v4054_v60, %v758_v24 }
  0xb8   :  { %v621_v48 = vxor.u32 2147483648, %v620_v11  ;;  %v762_v63 = vor.u32 %v761_v18, %v760_v3  ;;  %v769_v32 = vshll.u32 %v4054_v60, %v757_v7  ;;  %v770_v26 = vshrl.u32 %v4055_v62, %v758_v24 }
  0xb9   :  { %v3702_v22 = vadd.s32 4294967294, %v708_v57  ;;  %v765_v45 = vor.u32 %v764_v34, %v763_v12  ;;  %v768_v35 = vor.u32 %v767_v25, %v766_v4  ;;  %v772_v30 = vshll.u32 %v4055_v62, %v757_v7 }
  0xba   :  { %v622_v27 = vsel %vm539_vm2, %v621_v48, %v620_v11  ;;  %v771_v42 = vor.u32 %v770_v26, %v769_v32  ;;  %v773_v15 = vshrl.u32 %v4056_v6, %v758_v24  ;;  %vm776_vm2 = vcmp.lt.s32.totalorder %v4696_v5, 2 }
  0xbb   :  { %v625_v29 = vsel %vm4625_vm10, %v4317_v50, %v622_v27  ;;  %vm3703_vm5 = vcmp.lt.s32.totalorder %v3702_v22, 0  ;;  %vm778_vm6 = vcmp.lt.s32.totalorder %v4696_v5, 4  ;;  %v783_v61 = vsel %vm775_vm3, %v762_v63, %v765_v45 }
  0xbc   :  { %3969 = vcosq.f32 %v625_v29  ;;  %v711_v52 = vsel %vm3703_vm5, 0, %v3702_v22  ;;  %v780_v21 = vsel %vm778_vm6, %v768_v35, 2102212464  ;;  %v784_v20 = vsel %vm778_vm6, %v771_v42, 920167782 }
  0xbd   :  { %3971 = vsinq.f32 %v625_v29  ;;  %v712_v8 = vsub.s32 32, %v711_v52  ;;  %v713_v33 = vshll.u32 %v4684_v14, %v711_v52  ;;  %v716_v55 = vsub.s32 4294967266, %v711_v52 }
  0xbe   :  { %v774_v0 = vor.u32 %v773_v15, %v772_v30  ;;  %v779_v41 = vsel %vm775_vm3, %v759_v49, %v762_v63  ;;  %v781_v14 = vsel %vm777_vm4, %v765_v45, %v780_v21  ;;  %v785_v17 = vsel %vm777_vm4, %v768_v35, %v784_v20 }
  0xbf   :  { %v714_v46 = vshrl.u32 %v696_v2, %v712_v8  ;;  %v717_v37 = vadd.s32 127, %v716_v55  ;;  %v786_v7 = vsel %vm776_vm2, %v783_v61, %v785_v17  ;;  %v787_v9 = vsel %vm775_vm3, %v765_v45, %v768_v35 }
  0xc0   :  { %vm632_vm7 = vcmp.eq.s32.totalorder %v4702_v53, 0  ;;  %v788_v43 = vsel %vm778_vm6, %v774_v0, 1326507024  ;;  %v4752_v2 = vmul.u32.u64.low %v4707_v23, %v786_v7  ;;  %v4753_v10 = vmul.u32.u64.high %v4707_v23, %v786_v7, %v4752_v2 }
  0xc1   :  { %v715_v47 = vor.u32 %v714_v46, %v713_v33  ;;  %v718_v51 = vshll.u32 %v717_v37, 23  ;;  %v789_v3 = vsel %vm777_vm4, %v771_v42, %v788_v43  ;;  %v3708_v57 = vadd.s32 4294967169, %v850_v36 }
  0xc2   :  { %v2386_v48 = vadd.s32 3, %v4716_v59  ;;  %v782_v49 = vsel %vm776_vm2, %v779_v41, %v781_v14  ;;  %v790_v18 = vsel %vm776_vm2, %v787_v9, %v789_v3  ;;  %v854_v12 = vor.u32 8388608, %v4711_v16 }
  0xc3   :  { %v719_v11 = vor.u32 4788187, %v718_v51  ;;  %v722_v24 = vcvt.s32.f32 %v715_v47  ;;  %vm631_vm8 = vcmp.lt.s32.totalorder %v4702_v53, 2  ;;  %v856_v25 = vadd.s32 1, %v3708_v57 }
  0xc4   :  { %v4766_v34 = vmul.u32.u64.low %v4707_v23, %v790_v18  ;;  %v4767_v4 = vmul.u32.u64.high %v4707_v23, %v790_v18, %v4766_v34  ;;  %vm2284_vm9 = vcmp.lt.s32.totalorder %v4700_v19, 2  ;;  %vm2285_vm10 = vcmp.eq.s32.totalorder %v4700_v19, 0 }
  0xc5   :  { %v720_v22 = vand.u32 2147483647, %v719_v11  ;;  %vm2288_vm11 = vcmp.eq.s32.totalorder %v4700_v19, 2  ;;  %v30_v5 = vadd.s32 64, %v4088_v1  ;;  %v801_v32 = vadd.s32 1, %v4753_v10 }
  0xc6   :  { %v3970_v27 = vpop.eup %3969  ;;  %vm857_vm12 = vcmp.gt.s32.totalorder %v856_v25, 0  ;;  %vm635_vm13 = vcmp.eq.s32.totalorder %v4702_v53, 2  ;;  %v798_v29 = vmul.u32 %v4707_v23, %v782_v49  ;;  %v4777_v45 = vadd.s32 72, %v4088_v1 }
  0xc7   :  { %v3972_v36 = vpop.eup %3971  ;;  %v636_v63 = vxor.u32 2147483648, %v3970_v27  ;;  %v723_v16 = vmul.f32 %v722_v24, %v720_v22  ;;  %v4779_v52 = vand.u32 3, %v2386_v48  ;;  %v4782_v42 = vand.u32 3, %v4716_v59 }
  0xc8   :  { %v633_v26 = vxor.u32 2147483648, %v3972_v36  ;;  %v4784_v30 = vshll.u32 %v854_v12, 8  ;;  %vm629_vm14 = vweird.f32 %v4317_v50  ;;  %vm800_vm15 = vc.u32 %v4767_v4, %v4752_v2 }
  0xc9   :  { %v724_v35 = vxor.u32 2147483648, %v723_v16  ;;  %v858_v8 = vsel %vm857_vm12, %v856_v25, 0  ;;  %v46_v33 = vcvt.s32.f32 %v30_v5  ;;  %v4790_v23 = vadd.s32 80, %v4088_v1 }
  0xca   :  { %v2287_v15 = vsel %vm2285_vm10, %v3970_v27, %v633_v26  ;;  %v2290_v59 = vsel %vm2288_vm11, %v636_v63, %v3972_v36  ;;  %v802_v61 = vsel %vm800_vm15, %v801_v32, %v4753_v10  ;;  %v637_v37 = vsel %vm635_vm13, %v636_v63, %v3972_v36 }
  0xcb   :  { %v725_v55 = vsel %vm642_vm0, %v724_v35, %v723_v16  ;;  %v803_v21 = vadd.s32 %v802_v61, %v798_v29  ;;  %v47_v20 = vcvt.s32.f32 %v4777_v45  ;;  %v634_v0 = vsel %vm632_vm7, %v3970_v27, %v633_v26 }
  0xcc   :  { %v728_v46 = vsel %vm4691_vm1, %v4464_v44, %v725_v55  ;;  %v4807_v41 = vshrl.u32 %v858_v8, 5  ;;  %v860_v14 = vand.u32 31, %v858_v8  ;;  %v2291_v17 = vsel %vm2284_vm9, %v2287_v15, %v2290_v59 }
  0xcd   :  { %3973 = vcosq.f32 %v728_v46  ;;  %v804_v47 = vadd.s32 536870912, %v803_v21  ;;  %v4811_v13 = vmul.f32 -0.071955785, %v46_v33  ;;  %vm2392_vm0 = vcmp.eq.s32.totalorder %v4779_v52, 2 }
  0xce   :  { %3975 = vsinq.f32 %v728_v46  ;;  %vm738_vm1 = vcmp.eq.s32.totalorder %v4782_v42, 2  ;;  %v861_v51 = vsub.s32 32, %v860_v14  ;;  %v863_v7 = vshll.u32 %v4051_v54, %v860_v14 }
  0xcf   :  { %v866_v9 = vshll.u32 %v4052_v56, %v860_v14  ;;  %v869_v43 = vshll.u32 %v4053_v58, %v860_v14  ;;  %vm2389_vm3 = vcmp.eq.s32.totalorder %v4779_v52, 0  ;;  %v638_v19 = vsel %vm631_vm8, %v634_v0, %v637_v37 }
  0xd0   :  { %vm735_vm4 = vcmp.eq.s32.totalorder %v4782_v42, 0  ;;  %v4822_v10 = vshrl.u32 %v804_v47, 30  ;;  %v872_v11 = vshll.u32 %v4054_v60, %v860_v14  ;;  %v875_v24 = vshll.u32 %v4055_v62, %v860_v14 }
  0xd1   :  { %vm2388_vm5 = vcmp.lt.s32.totalorder %v4779_v52, 2  ;;  %vm734_vm2 = vcmp.lt.s32.totalorder %v4782_v42, 2  ;;  %v864_v3 = vshrl.u32 %v4052_v56, %v861_v51  ;;  %v867_v57 = vshrl.u32 %v4053_v58, %v861_v51 }
  0xd2   :  { %v870_v48 = vshrl.u32 %v4054_v60, %v861_v51  ;;  %vm878_vm6 = vcmp.lt.s32.totalorder %v4807_v41, 1  ;;  %vm732_vm7 = vweird.f32 %v4464_v44  ;;  %v806_v53 = vshll.u32 %v4822_v10, 30 }
  0xd3   :  { %v873_v49 = vshrl.u32 %v4055_v62, %v861_v51  ;;  %v876_v18 = vshrl.u32 %v4056_v6, %v861_v51  ;;  %vm881_vm8 = vcmp.lt.s32.totalorder %v4807_v41, 4  ;;  %v862_v12 = vshrl.u32 %v4051_v54, %v861_v51 }
  0xd4   :  { %v865_v22 = vor.u32 %v864_v3, %v863_v7  ;;  %v868_v34 = vor.u32 %v867_v57, %v866_v9  ;;  %v871_v25 = vor.u32 %v870_v48, %v869_v43  ;;  %v4838_v27 = vsub.s32 %v803_v21, %v806_v53 }
  0xd5   :  { %v874_v5 = vor.u32 %v873_v49, %v872_v11  ;;  %v877_v36 = vor.u32 %v876_v18, %v875_v24  ;;  %vm880_vm9 = vcmp.lt.s32.totalorder %v4807_v41, 3  ;;  %v2292_v63 = vsel %vm629_vm14, nan, %v2291_v17 }
  0xd6   :  { %vm879_vm10 = vcmp.lt.s32.totalorder %v4807_v41, 2  ;;  %v883_v16 = vsel %vm881_vm8, %v871_v25, 2102212464  ;;  %v886_v32 = vsel %vm878_vm6, %v865_v22, %v868_v34  ;;  %v639_v26 = vsel %vm629_vm14, nan, %v638_v19 }
  0xd7   :  { %v809_v29 = vsub.s32 0, %v4838_v27  ;;  %v887_v35 = vsel %vm881_vm8, %v874_v5, 920167782  ;;  %v890_v8 = vsel %vm878_vm6, %v868_v34, %v871_v25  ;;  %v3974_v33 = vpop.eup %3973  ;;  %v882_v55 = vsel %vm878_vm6, %v862_v12, %v865_v22 }
  0xd8   :  { %v884_v15 = vsel %vm880_vm9, %v868_v34, %v883_v16  ;;  %v888_v59 = vsel %vm880_vm9, %v871_v25, %v887_v35  ;;  %v891_v50 = vsel %vm881_vm8, %v877_v36, 1326507024  ;;  %v3976_v61 = vpop.eup %3975  ;;  %v739_v46 = vxor.u32 2147483648, %v3974_v33 }
  0xd9   :  { %v3705_v37 = vmin.u32 %v809_v29, %v4838_v27  ;;  %v889_v21 = vsel %vm879_vm10, %v886_v32, %v888_v59  ;;  %v892_v0 = vsel %vm880_vm9, %v874_v5, %v891_v50  ;;  %v736_v14 = vxor.u32 2147483648, %v3976_v61 }
  0xda   :  { %v893_v17 = vsel %vm879_vm10, %v890_v8, %v892_v0  ;;  %v4871_v47 = vmul.u32.u64.low %v4784_v30, %v889_v21  ;;  %v4872_v51 = vmul.u32.u64.high %v4784_v30, %v889_v21, %v4871_v47  ;;  %v2394_v7 = vsel %vm2392_vm0, %v739_v46, %v3976_v61 }
  0xdb   :  { %v740_v9 = vsel %vm738_vm1, %v739_v46, %v3976_v61  ;;  %v811_v43 = vclz %v3705_v37  ;;  %v885_v19 = vsel %vm879_vm10, %v882_v55, %v884_v15  ;;  %v2391_v11 = vsel %vm2389_vm3, %v3974_v33, %v736_v14 }
  0xdc   :  { %v737_v24 = vsel %vm735_vm4, %v3974_v33, %v736_v14  ;;  %v4886_v3 = vmul.u32.u64.low %v4784_v30, %v893_v17  ;;  %v4887_v57 = vmul.u32.u64.high %v4784_v30, %v893_v17, %v4886_v3  ;;  %v2395_v48 = vsel %vm2388_vm5, %v2391_v11, %v2394_v7 }
  0xdd   :  { %v741_v53 = vsel %vm734_vm2, %v737_v24, %v740_v9  ;;  %v799_v41 = vadd.s32 %v4752_v2, %v4767_v4  ;;  %v3706_v49 = vadd.s32 4294967294, %v811_v43  ;;  %v2396_v18 = vsel %vm732_vm7, nan, %v2395_v48 }
  0xde   :  { %v742_v12 = vsel %vm732_vm7, nan, %v741_v53  ;;  %v901_v22 = vmul.u32 %v4784_v30, %v885_v19  ;;  %v904_v34 = vadd.s32 1, %v4872_v51  ;;  %v3451_v25 = vpack.c.bf16 %v2396_v18, %v2292_v63 }
  0xdf   :  { %v3443_v52 = vpack.c.bf16 %v742_v12, %v639_v26  ;;  %vm3707_vm11 = vcmp.lt.s32.totalorder %v3706_v49, 0  ;;  %v86_v42 = vmul.f32 1.442695, %v4811_v13  ;;  %v829_v36 = vsub.s32 4, %v4822_v10 }
  0xe0   :  { %v814_v5 = vsel %vm3707_vm11, 0, %v3706_v49  ;;  %vm903_vm12 = vc.u32 %v4887_v57, %v4871_v47  ;;  %v63_v2 = vmul.f32 -0.071955785, %v47_v20  ;;  %3820 = vmatprep.subr.bf16.mxu0 %v3451_v25  ;;  %vm745_vm13 = vcmp.lt.s32.totalorder %v4562_v39, 0 }
  0xe1   :  { %v815_v44 = vsub.s32 32, %v814_v5  ;;  %v816_v4 = vshll.u32 %v4838_v27, %v814_v5  ;;  %v819_v30 = vsub.s32 4294967266, %v814_v5  ;;  %v905_v63 = vsel %vm903_vm12, %v904_v34, %v4872_v51  ;;  %3821 = vmatpush3.bf16.msra.mxu0 %v3443_v52 }
  0xe2   :  { %v906_v16 = vadd.s32 %v905_v63, %v901_v22  ;;  %3977 = vpow2.f32 %v86_v42  ;;  %v88_v29 = vmul.f32 1.442695, %v63_v2  ;;  %v48_v35 = vcvt.s32.f32 %v4790_v23 }
  0xe3   :  { %v817_v32 = vshrl.u32 %v799_v41, %v815_v44  ;;  %v820_v13 = vadd.s32 127, %v819_v30  ;;  %v830_v27 = vsel %vm745_vm13, %v829_v36, %v4822_v10  ;;  %vm4916_vm14 = vcmp.le.f32.partialorder %v743_v28, 0.7853982 }
  0xe4   :  { %v907_v26 = vadd.s32 536870912, %v906_v16  ;;  %3979 = vpow2.f32 %v88_v29  ;;  %v832_v59 = vsel %vm4916_vm14, 0, %v830_v27  ;;  %v64_v50 = vmul.f32 -0.071955785, %v48_v35 }
  0xe5   :  { %v818_v45 = vor.u32 %v817_v32, %v816_v4  ;;  %v821_v20 = vshll.u32 %v820_v13, 23  ;;  %v2490_v21 = vadd.s32 3, %v832_v59  ;;  %v33_v10 = vadd.s32 88, %v4088_v1 }
  0xe6   :  { %v908_v8 = vshrl.u32 %v907_v26, 30  ;;  %v90_v14 = vmul.f32 1.442695, %v64_v50  ;;  %vm848_vm15 = vcmp.lt.s32.totalorder %v4682_v38, 0  ;;  %vm4936_vm0 = vcmp.le.f32.partialorder %v846_v31, 0.7853982 }
  0xe7   :  { %v822_v55 = vor.u32 4788187, %v821_v20  ;;  %v825_v15 = vcvt.s32.f32 %v818_v45  ;;  %v4925_v43 = vand.u32 3, %v2490_v21  ;;  %v49_v11 = vcvt.s32.f32 %v33_v10 }
  0xe8   :  { %v909_v23 = vshll.u32 %v908_v8, 30  ;;  %v932_v7 = vsub.s32 4, %v908_v8  ;;  %3981 = vpow2.f32 %v90_v14  ;;  %v902_v34 = vadd.s32 %v4871_v47, %v4887_v57 }
  0xe9   :  { %v823_v61 = vand.u32 2147483647, %v822_v55  ;;  %vm2496_vm1 = vcmp.eq.s32.totalorder %v4925_v43, 2  ;;  %v4950_v31 = vand.u32 3, %v832_v59  ;;  %v65_v25 = vmul.f32 -0.071955785, %v49_v11 }
  0xea   :  { %v910_v46 = vsub.s32 %v906_v16, %v909_v23  ;;  %v933_v12 = vsel %vm848_vm15, %v932_v7, %v908_v8  ;;  %vm2493_vm4 = vcmp.eq.s32.totalorder %v4925_v43, 0  ;;  %v4955_v5 = vadd.s32 96, %v4088_v1 }
  0xeb   :  { %v826_v37 = vmul.f32 %v825_v15, %v823_v61  ;;  %v935_v2 = vsel %vm4936_vm0, 0, %v933_v12  ;;  %vm2492_vm5 = vcmp.lt.s32.totalorder %v4925_v43, 2  ;;  %vm838_vm2 = vcmp.eq.s32.totalorder %v4950_v31, 0 }
  0xec   :  { %v912_v0 = vsub.s32 0, %v910_v46  ;;  %v3978_v17 = vpop.eup %3977  ;;  %vm841_vm6 = vcmp.eq.s32.totalorder %v4950_v31, 2  ;;  %v92_v32 = vmul.f32 1.442695, %v65_v25  ;;  %v4966_v35 = vadd.s32 104, %v4088_v1 }
  0xed   :  { %v827_v28 = vxor.u32 2147483648, %v826_v37  ;;  %v4928_v19 = vmul.f32 %v4678_v40, %v3978_v17  ;;  %v2594_v45 = vadd.s32 3, %v935_v2  ;;  %v50_v8 = vcvt.s32.f32 %v4955_v5 }
  0xee   :  { %v3709_v51 = vmin.u32 %v912_v0, %v910_v46  ;;  %v3980_v24 = vpop.eup %3979  ;;  %v4973_v50 = vand.u32 3, %v935_v2  ;;  %vm837_vm8 = vcmp.lt.s32.totalorder %v4950_v31, 2  ;;  %vm835_vm11 = vweird.f32 %v4562_v39 }
  0xef   :  { %v828_v9 = vsel %vm745_vm13, %v827_v28, %v826_v37  ;;  %v4941_v41 = vmul.f32 %v4678_v40, %v3980_v24  ;;  %v949_v49 = vand.u32 2147483647, %v4928_v19  ;;  %v952_v22 = vand.u32 2139095040, %v4928_v19 }
  0xf0   :  { %v831_v3 = vsel %vm4916_vm14, %v4562_v39, %v828_v9  ;;  %v914_v48 = vclz %v3709_v51  ;;  %v4979_v28 = vand.u32 3, %v2594_v45 }
  0xf1   :  { %3983 = vcosq.f32 %v831_v3  ;;  %v953_v52 = vshrl.u32 %v952_v22, 23  ;;  %v1055_v42 = vand.u32 2139095040, %v4941_v41  ;;  %v956_v47 = vand.u32 8388607, %v949_v49 }
  0xf2   :  { %3985 = vsinq.f32 %v831_v3  ;;  %v3710_v18 = vadd.s32 4294967294, %v914_v48  ;;  %v1052_v57 = vand.u32 2147483647, %v4941_v41  ;;  %v3982_v33 = vpop.eup %3981 }
  0xf3   :  { %v3712_v63 = vadd.s32 4294967169, %v953_v52  ;;  %v1056_v16 = vshrl.u32 %v1055_v42, 23  ;;  %v957_v20 = vor.u32 8388608, %v956_v47  ;;  %3987 = vpow2.f32 %v92_v32 }
  0xf4   :  { %vm3711_vm3 = vcmp.lt.s32.totalorder %v3710_v18, 0  ;;  %v4971_v59 = vand.u32 8388607, %v1052_v57  ;;  %v4988_v3 = vmul.f32 %v4678_v40, %v3982_v33 }
  0xf5   :  { %v917_v36 = vsel %vm3711_vm3, 0, %v3710_v18  ;;  %v959_v29 = vadd.s32 1, %v3712_v63  ;;  %v3716_v27 = vadd.s32 4294967169, %v1056_v16  ;;  %v4981_v7 = vshll.u32 %v957_v20, 8 }
  0xf6   :  { %v918_v44 = vsub.s32 32, %v917_v36  ;;  %v919_v4 = vshll.u32 %v910_v46, %v917_v36  ;;  %v922_v30 = vsub.s32 4294967266, %v917_v36  ;;  %v1060_v24 = vor.u32 8388608, %v4971_v59 }
  0xf7   :  { %vm960_vm7 = vcmp.gt.s32.totalorder %v959_v29, 0  ;;  %v4975_v46 = vadd.s32 1, %v3716_v27  ;;  %vm940_vm3 = vcmp.lt.s32.totalorder %v4973_v50, 2 }
  0xf8   :  { %v920_v13 = vshrl.u32 %v902_v34, %v918_v44  ;;  %v923_v26 = vadd.s32 127, %v922_v30  ;;  %v961_v61 = vsel %vm960_vm7, %v959_v29, 0 }
  0xf9   :  { %v4977_v14 = vshrl.u32 %v961_v61, 5  ;;  %v963_v51 = vand.u32 31, %v961_v61  ;;  %vm1063_vm9 = vcmp.gt.s32.totalorder %v4975_v46, 0 }
  0xfa   :  { %v921_v55 = vor.u32 %v920_v13, %v919_v4  ;;  %v924_v15 = vshll.u32 %v923_v26, 23 }
  0xfb   :  { %v3984_v23 = vpop.eup %3983  ;;  %v964_v18 = vsub.s32 32, %v963_v51  ;;  %v966_v12 = vshll.u32 %v4051_v54, %v963_v51  ;;  %v969_v25 = vshll.u32 %v4052_v56, %v963_v51  ;;  %vm981_vm10 = vcmp.lt.s32.totalorder %v4977_v14, 1 }
  0xfc   :  { %v3986_v37 = vpop.eup %3985  ;;  %v842_v21 = vxor.u32 2147483648, %v3984_v23  ;;  %v925_v10 = vor.u32 4788187, %v924_v15  ;;  %v928_v0 = vcvt.s32.f32 %v921_v55  ;;  %v972_v4 = vshll.u32 %v4053_v58, %v963_v51 }
  0xfd   :  { %v839_v17 = vxor.u32 2147483648, %v3986_v37  ;;  %v965_v36 = vshrl.u32 %v4051_v54, %v964_v18  ;;  %v967_v2 = vshrl.u32 %v4052_v56, %v964_v18  ;;  %v970_v44 = vshrl.u32 %v4053_v58, %v964_v18  ;;  %v5014_v20 = vpop.eup %3987 }
  0xfe   :  { %v926_v9 = vand.u32 2147483647, %v925_v10  ;;  %v2498_v11 = vsel %vm2496_vm1, %v842_v21, %v3986_v37  ;;  %v843_v34 = vsel %vm841_vm6, %v842_v21, %v3986_v37  ;;  %v973_v30 = vshrl.u32 %v4054_v60, %v964_v18 }
  0xff   :  { %v2495_v48 = vsel %vm2493_vm4, %v3984_v23, %v839_v17  ;;  %v840_v42 = vsel %vm838_vm2, %v3984_v23, %v839_v17  ;;  %v968_v63 = vor.u32 %v967_v2, %v966_v12  ;;  %v975_v16 = vshll.u32 %v4054_v60, %v963_v51 }
 0x100   :  { %v929_v22 = vmul.f32 %v928_v0, %v926_v9  ;;  %v2499_v52 = vsel %vm2492_vm5, %v2495_v48, %v2498_v11  ;;  %v976_v43 = vshrl.u32 %v4055_v62, %v964_v18  ;;  %v978_v32 = vshll.u32 %v4055_v62, %v963_v51 }
 0x101   :  { %v971_v26 = vor.u32 %v970_v44, %v969_v25  ;;  %v974_v29 = vor.u32 %v973_v30, %v972_v4  ;;  %v979_v45 = vshrl.u32 %v4056_v6, %v964_v18  ;;  %vm982_vm12 = vcmp.lt.s32.totalorder %v4977_v14, 2 }
 0x102   :  { %v930_v47 = vxor.u32 2147483648, %v929_v22  ;;  %v977_v33 = vor.u32 %v976_v43, %v975_v16  ;;  %vm983_vm13 = vcmp.lt.s32.totalorder %v4977_v14, 3  ;;  %vm984_vm14 = vcmp.lt.s32.totalorder %v4977_v14, 4 }
 0x103   :  { %v980_v55 = vor.u32 %v979_v45, %v978_v32  ;;  %v985_v15 = vsel %vm981_vm10, %v965_v36, %v968_v63  ;;  %v986_v23 = vsel %vm984_vm14, %v974_v29, 2102212464  ;;  %v989_v61 = vsel %vm981_vm10, %v968_v63, %v971_v26 }
 0x104   :  { %v931_v13 = vsel %vm848_vm15, %v930_v47, %v929_v22  ;;  %v990_v37 = vsel %vm984_vm14, %v977_v33, 920167782  ;;  %vm944_vm15 = vcmp.eq.s32.totalorder %v4973_v50, 2  ;;  %v987_v53 = vsel %vm983_vm13, %v971_v26, %v986_v23 }
 0x105   :  { %v934_v27 = vsel %vm4936_vm0, %v4682_v38, %v931_v13  ;;  %v991_v21 = vsel %vm983_vm13, %v974_v29, %v990_v37  ;;  %v993_v10 = vsel %vm981_vm10, %v971_v26, %v974_v29  ;;  %v994_v0 = vsel %vm984_vm14, %v980_v55, 1326507024 }
 0x106   :  { %3989 = vcosq.f32 %v934_v27  ;;  %v844_v17 = vsel %vm837_vm8, %v840_v42, %v843_v34  ;;  %vm941_vm0 = vcmp.eq.s32.totalorder %v4973_v50, 0  ;;  %v992_v51 = vsel %vm982_vm12, %v989_v61, %v991_v21 }
 0x107   :  { %3991 = vsinq.f32 %v934_v27  ;;  %v995_v9 = vsel %vm983_vm13, %v977_v33, %v994_v0  ;;  %v1064_v11 = vsel %vm1063_vm9, %v4975_v46, 0  ;;  %vm2596_vm1 = vcmp.lt.s32.totalorder %v4979_v28, 2 }
 0x108   :  { %v988_v31 = vsel %vm982_vm12, %v985_v15, %v987_v53  ;;  %v996_v48 = vsel %vm982_vm12, %v993_v10, %v995_v9  ;;  %v5050_v18 = vmul.u32.u64.low %v4981_v7, %v992_v51  ;;  %v5051_v12 = vmul.u32.u64.high %v4981_v7, %v992_v51, %v5050_v18 }
 0x109   :  { %vm938_vm4 = vweird.f32 %v4682_v38  ;;  %vm2597_vm5 = vcmp.eq.s32.totalorder %v4979_v28, 0  ;;  %v5057_v46 = vmul.u32.u64.low %v4981_v7, %v996_v48  ;;  %v5058_v22 = vmul.u32.u64.high %v4981_v7, %v996_v48, %v5057_v46 }
 0x10a   :  { %v1066_v34 = vand.u32 31, %v1064_v11  ;;  %v2500_v25 = vsel %vm835_vm11, nan, %v2499_v52  ;;  %vm2600_vm2 = vcmp.eq.s32.totalorder %v4979_v28, 2  ;;  %v5065_v14 = vshll.u32 %v1060_v24, 8 }
 0x10b   :  { %v1158_v42 = vand.u32 2139095040, %v4988_v3  ;;  %v845_v36 = vsel %vm835_vm11, nan, %v844_v17  ;;  %v1004_v2 = vmul.u32 %v4981_v7, %v988_v31  ;;  %v5071_v47 = vshrl.u32 %v1064_v11, 5 }
 0x10c   :  { %v1067_v44 = vsub.s32 32, %v1066_v34  ;;  %v1007_v4 = vadd.s32 1, %v5051_v12  ;;  %v1069_v52 = vshll.u32 %v4051_v54, %v1066_v34  ;;  %v1072_v30 = vshll.u32 %v4052_v56, %v1066_v34 }
 0x10d   :  { %v1075_v59 = vshll.u32 %v4053_v58, %v1066_v34  ;;  %vm1006_vm6 = vc.u32 %v5058_v22, %v5050_v18  ;;  %v1078_v39 = vshll.u32 %v4054_v60, %v1066_v34  ;;  %v1081_v7 = vshll.u32 %v4055_v62, %v1066_v34 }
 0x10e   :  { %v1070_v24 = vshrl.u32 %v4052_v56, %v1067_v44  ;;  %v1008_v16 = vsel %vm1006_vm6, %v1007_v4, %v5051_v12  ;;  %v1073_v43 = vshrl.u32 %v4053_v58, %v1067_v44  ;;  %v1076_v32 = vshrl.u32 %v4054_v60, %v1067_v44 }
 0x10f   :  { %v1079_v13 = vshrl.u32 %v4055_v62, %v1067_v44  ;;  %v1009_v45 = vadd.s32 %v1008_v16, %v1004_v2  ;;  %v1082_v27 = vshrl.u32 %v4056_v6, %v1067_v44  ;;  %vm1084_vm7 = vcmp.lt.s32.totalorder %v5071_v47, 1 }
 0x110   :  { %v3990_v63 = vpop.eup %3989  ;;  %v1068_v55 = vshrl.u32 %v4051_v54, %v1067_v44  ;;  %v1071_v15 = vor.u32 %v1070_v24, %v1069_v52  ;;  %v1074_v23 = vor.u32 %v1073_v43, %v1072_v30  ;;  %v1077_v21 = vor.u32 %v1076_v32, %v1075_v59 }
 0x111   :  { %v3992_v26 = vpop.eup %3991  ;;  %v945_v29 = vxor.u32 2147483648, %v3990_v63  ;;  %v1010_v53 = vadd.s32 536870912, %v1009_v45  ;;  %v1080_v17 = vor.u32 %v1079_v13, %v1078_v39  ;;  %v1083_v51 = vor.u32 %v1082_v27, %v1081_v7 }
 0x112   :  { %v942_v33 = vxor.u32 2147483648, %v3992_v26  ;;  %vm1087_vm8 = vcmp.lt.s32.totalorder %v5071_v47, 4  ;;  %vm1086_vm9 = vcmp.lt.s32.totalorder %v5071_v47, 3  ;;  %vm1085_vm10 = vcmp.lt.s32.totalorder %v5071_v47, 2 }
 0x113   :  { %v2602_v61 = vsel %vm2600_vm2, %v945_v29, %v3992_v26  ;;  %v946_v37 = vsel %vm944_vm15, %v945_v29, %v3992_v26  ;;  %v1011_v31 = vshrl.u32 %v1010_v53, 30  ;;  %v1089_v46 = vsel %vm1087_vm8, %v1077_v21, 2102212464 }
 0x114   :  { %v2599_v10 = vsel %vm2597_vm5, %v3990_v63, %v942_v33  ;;  %v943_v0 = vsel %vm941_vm0, %v3990_v63, %v942_v33  ;;  %v1088_v50 = vsel %vm1084_vm7, %v1068_v55, %v1071_v15  ;;  %v1092_v44 = vsel %vm1084_vm7, %v1071_v15, %v1074_v23 }
 0x115   :  { %v2603_v9 = vsel %vm2596_vm1, %v2599_v10, %v2602_v61  ;;  %v947_v11 = vsel %vm940_vm3, %v943_v0, %v946_v37  ;;  %v1012_v2 = vshll.u32 %v1011_v31, 30  ;;  %v1093_v38 = vsel %vm1087_vm8, %v1080_v17, 920167782 }
 0x116   :  { %v2604_v48 = vsel %vm938_vm4, nan, %v2603_v9  ;;  %v948_v12 = vsel %vm938_vm4, nan, %v947_v11  ;;  %v1159_v4 = vshrl.u32 %v1158_v42, 23  ;;  %v1090_v30 = vsel %vm1086_vm9, %v1074_v23, %v1089_v46 }
 0x117   :  { %v3452_v34 = vpack.c.bf16 %v2604_v48, %v2500_v25  ;;  %v3444_v28 = vpack.c.bf16 %v948_v12, %v845_v36  ;;  %v1013_v52 = vsub.s32 %v1009_v45, %v1012_v2  ;;  %v1094_v25 = vsel %vm1086_vm9, %v1077_v21, %v1093_v38 }
 0x118   :  { %v1096_v36 = vsel %vm1084_vm7, %v1074_v23, %v1077_v21  ;;  %v1095_v59 = vsel %vm1085_vm10, %v1092_v44, %v1094_v25  ;;  %v1097_v24 = vsel %vm1087_vm8, %v1083_v51, 1326507024  ;;  %v51_v42 = vcvt.s32.f32 %v4966_v35 }
 0x119   :  { %3822 = vmatprep.subr.bf16.mxu0 %v3452_v34  ;;  %v1015_v39 = vsub.s32 0, %v1013_v52  ;;  %v1098_v7 = vsel %vm1086_vm9, %v1080_v17, %v1097_v24  ;;  %v5130_v63 = vmul.u32.u64.low %v5065_v14, %v1095_v59  ;;  %v5131_v16 = vmul.u32.u64.high %v5065_v14, %v1095_v59, %v5130_v63 }
 0x11a   :  { %3823 = vmatpush3.bf16.msra.mxu0 %v3444_v28  ;;  %v1091_v43 = vsel %vm1085_vm10, %v1088_v50, %v1090_v30  ;;  %v1099_v32 = vsel %vm1085_vm10, %v1096_v36, %v1098_v7  ;;  %v3720_v13 = vadd.s32 4294967169, %v1159_v4  ;;  %v66_v45 = vmul.f32 -0.071955785, %v50_v8 }
 0x11b   :  { %v3713_v26 = vmin.u32 %v1015_v39, %v1013_v52  ;;  %v5139_v29 = vmul.u32.u64.low %v5065_v14, %v1099_v32  ;;  %v5140_v35 = vmul.u32.u64.high %v5065_v14, %v1099_v32, %v5139_v29  ;;  %v67_v27 = vmul.f32 -0.071955785, %v51_v42 }
 0x11c   :  { %v1107_v55 = vmul.u32 %v5065_v14, %v1091_v43  ;;  %v1110_v15 = vadd.s32 1, %v5131_v16  ;;  %v1165_v23 = vadd.s32 1, %v3720_v13  ;;  %v1035_v61 = vsub.s32 4, %v1011_v31 }
 0x11d   :  { %v1017_v33 = vclz %v3713_v26  ;;  %v1155_v47 = vand.u32 2147483647, %v4988_v3  ;;  %vm1109_vm11 = vc.u32 %v5140_v35, %v5130_v63  ;;  %v94_v53 = vmul.f32 1.442695, %v66_v45 }
 0x11e   :  { %vm1166_vm12 = vcmp.gt.s32.totalorder %v1165_v23, 0  ;;  %vm951_vm13 = vcmp.lt.s32.totalorder %v4928_v19, 0  ;;  %v1111_v5 = vsel %vm1109_vm11, %v1110_v15, %v5131_v16  ;;  %v5151_v21 = vmul.f32 1.442695, %v67_v27 }
 0x11f   :  { %v3714_v37 = vadd.s32 4294967294, %v1017_v33  ;;  %v1167_v8 = vsel %vm1166_vm12, %v1165_v23, 0  ;;  %v1005_v14 = vadd.s32 %v5050_v18, %v5058_v22  ;;  %v1112_v10 = vadd.s32 %v1111_v5, %v1107_v55 }
 0x120   :  { %v1169_v0 = vand.u32 31, %v1167_v8  ;;  %v1036_v51 = vsel %vm951_vm13, %v1035_v61, %v1011_v31  ;;  %v5159_v9 = vmul.f32 %v4678_v40, %v5014_v20  ;;  %v1162_v11 = vand.u32 8388607, %v1155_v47 }
 0x121   :  { %vm3715_vm14 = vcmp.lt.s32.totalorder %v3714_v37, 0  ;;  %v1113_v34 = vadd.s32 536870912, %v1112_v10  ;;  %vm5165_vm15 = vcmp.le.f32.partialorder %v949_v49, 0.7853982  ;;  %3993 = vpow2.f32 %v94_v53 }
 0x122   :  { %v1020_v17 = vsel %vm3715_vm14, 0, %v3714_v37  ;;  %v1170_v22 = vsub.s32 32, %v1169_v0  ;;  %v1258_v31 = vand.u32 2147483647, %v5159_v9  ;;  %v5172_v20 = vsel %vm5165_vm15, 0, %v1036_v51 }
 0x123   :  { %v1021_v48 = vsub.s32 32, %v1020_v17  ;;  %v1022_v12 = vshll.u32 %v1013_v52, %v1020_v17  ;;  %v1025_v46 = vsub.s32 4294967266, %v1020_v17  ;;  %v1114_v2 = vshrl.u32 %v1113_v34, 30 }
 0x124   :  { %v1163_v50 = vor.u32 8388608, %v1162_v11  ;;  %v5174_v44 = vshrl.u32 %v1167_v8, 5  ;;  %v1172_v38 = vshll.u32 %v4051_v54, %v1169_v0  ;;  %v1175_v49 = vshll.u32 %v4052_v56, %v1169_v0 }
 0x125   :  { %v1023_v28 = vshrl.u32 %v1005_v14, %v1021_v48  ;;  %v1026_v40 = vadd.s32 127, %v1025_v46  ;;  %v1115_v30 = vshll.u32 %v1114_v2, 30  ;;  %v1178_v25 = vshll.u32 %v4053_v58, %v1169_v0 }
 0x126   :  { %v1173_v36 = vshrl.u32 %v4052_v56, %v1170_v22  ;;  %v1176_v59 = vshrl.u32 %v4053_v58, %v1170_v22  ;;  %v1181_v24 = vshll.u32 %v4054_v60, %v1169_v0  ;;  %v1182_v42 = vshrl.u32 %v4055_v62, %v1170_v22 }
 0x127   :  { %v1024_v4 = vor.u32 %v1023_v28, %v1022_v12  ;;  %v1027_v52 = vshll.u32 %v1026_v40, 23  ;;  %vm1054_vm0 = vcmp.lt.s32.totalorder %v4941_v41, 0  ;;  %v5184_v16 = vsub.s32 %v1112_v10, %v1115_v30 }
 0x128   :  { %v1179_v43 = vshrl.u32 %v4054_v60, %v1170_v22  ;;  %v2698_v32 = vadd.s32 3, %v5172_v20  ;;  %v1171_v13 = vshrl.u32 %v4051_v54, %v1170_v22  ;;  %v5189_v26 = vshll.u32 %v1163_v50, 8 }
 0x129   :  { %v1028_v39 = vor.u32 4788187, %v1027_v52  ;;  %v1031_v7 = vcvt.s32.f32 %v1024_v4  ;;  %v1261_v29 = vand.u32 2139095040, %v5159_v9  ;;  %v1118_v27 = vsub.s32 0, %v5184_v16 }
 0x12a   :  { %v1184_v33 = vshll.u32 %v4055_v62, %v1169_v0  ;;  %v1185_v55 = vshrl.u32 %v4056_v6, %v1170_v22  ;;  %v1108_v15 = vadd.s32 %v5130_v63, %v5140_v35  ;;  %v1174_v23 = vor.u32 %v1173_v36, %v1172_v38 }
 0x12b   :  { %v1029_v45 = vand.u32 2147483647, %v1028_v39  ;;  %v1177_v61 = vor.u32 %v1176_v59, %v1175_v49  ;;  %v1183_v37 = vor.u32 %v1182_v42, %v1181_v24  ;;  %v3717_v5 = vmin.u32 %v1118_v27, %v5184_v16  ;;  %v3994_v14 = vpop.eup %3993 }
 0x12c   :  { %v1180_v8 = vor.u32 %v1179_v43, %v1178_v25  ;;  %vm1187_vm1 = vcmp.lt.s32.totalorder %v5174_v44, 1  ;;  %vm5201_vm3 = vcmp.le.f32.partialorder %v1052_v57, 0.7853982  ;;  %v1138_v0 = vsub.s32 4, %v1114_v2 }
 0x12d   :  { %v1032_v53 = vmul.f32 %v1031_v7, %v1029_v45  ;;  %vm1189_vm4 = vcmp.lt.s32.totalorder %v5174_v44, 3  ;;  %vm1190_vm5 = vcmp.lt.s32.totalorder %v5174_v44, 4  ;;  %v1262_v63 = vshrl.u32 %v1261_v29, 23 }
 0x12e   :  { %v1120_v17 = vclz %v3717_v5  ;;  %v1186_v51 = vor.u32 %v1185_v55, %v1184_v33  ;;  %v1191_v11 = vsel %vm1187_vm1, %v1171_v13, %v1174_v23  ;;  %vm1188_vm2 = vcmp.lt.s32.totalorder %v5174_v44, 2 }
 0x12f   :  { %v1033_v35 = vxor.u32 2147483648, %v1032_v53  ;;  %v1192_v57 = vsel %vm1190_vm5, %v1180_v8, 2102212464  ;;  %v1195_v48 = vsel %vm1187_vm1, %v1174_v23, %v1177_v61  ;;  %v1196_v12 = vsel %vm1190_vm5, %v1183_v37, 920167782 }
 0x130   :  { %v3718_v34 = vadd.s32 4294967294, %v1120_v17  ;;  %v1193_v22 = vsel %vm1189_vm4, %v1177_v61, %v1192_v57  ;;  %v1197_v28 = vsel %vm1189_vm4, %v1180_v8, %v1196_v12  ;;  %v1139_v50 = vsel %vm1054_vm0, %v1138_v0, %v1114_v2 }
 0x131   :  { %v1034_v46 = vsel %vm951_vm13, %v1033_v35, %v1032_v53  ;;  %v1194_v38 = vsel %vm1188_vm2, %v1191_v11, %v1193_v22  ;;  %v1199_v49 = vsel %vm1187_vm1, %v1177_v61, %v1180_v8  ;;  %v1198_v4 = vsel %vm1188_vm2, %v1195_v48, %v1197_v28  ;;  %v5266_v8 = vld [vmem:[%s5945_s0] ss:$0 sm:$0xff] }
 0x132   :  { %v1037_v40 = vsel %vm5165_vm15, %v4928_v19, %v1034_v46  ;;  %vm3719_vm6 = vcmp.lt.s32.totalorder %v3718_v34, 0  ;;  %v1200_v52 = vsel %vm1190_vm5, %v1186_v51, 1326507024  ;;  %v3724_v2 = vadd.s32 4294967169, %v1262_v63 }
 0x133   :  { %3995 = vcosq.f32 %v1037_v40  ;;  %v1123_v18 = vsel %vm3719_vm6, 0, %v3718_v34  ;;  %v1201_v30 = vsel %vm1189_vm4, %v1183_v37, %v1200_v52  ;;  %v1141_v45 = vsel %vm5201_vm3, 0, %v1139_v50 }
 0x134   :  { %3997 = vsinq.f32 %v1037_v40  ;;  %v1124_v25 = vsub.s32 32, %v1123_v18  ;;  %v1125_v36 = vshll.u32 %v5184_v16, %v1123_v18  ;;  %v1128_v59 = vsub.s32 4294967266, %v1123_v18 }
 0x135   :  { %v1202_v24 = vsel %vm1188_vm2, %v1199_v49, %v1201_v30  ;;  %v5245_v7 = vmul.u32.u64.low %v5189_v26, %v1198_v4  ;;  %v5246_v43 = vmul.u32.u64.high %v5189_v26, %v1198_v4, %v5245_v7  ;;  %v1268_v27 = vadd.s32 1, %v3724_v2 }
 0x136   :  { %v5241_v42 = vmul.u32.u64.low %v5189_v26, %v1202_v24  ;;  %v5242_v39 = vmul.u32.u64.high %v5189_v26, %v1202_v24, %v5241_v42  ;;  %v1126_v13 = vshrl.u32 %v1108_v15, %v1124_v25  ;;  %v1129_v29 = vadd.s32 127, %v1128_v59 }
 0x137   :  { %v5251_v16 = vand.u32 3, %v2698_v32  ;;  %v5254_v44 = vand.u32 3, %v5172_v20  ;;  %v1265_v33 = vand.u32 8388607, %v1258_v31  ;;  %3999 = vpow2.f32 %v5151_v21 }
 0x138   :  { %v1127_v55 = vor.u32 %v1126_v13, %v1125_v36  ;;  %v1130_v23 = vshll.u32 %v1129_v29, 23  ;;  %v1210_v61 = vmul.u32 %v5189_v26, %v1194_v38  ;;  %vm1269_vm7 = vcmp.gt.s32.totalorder %v1268_v27, 0 }
 0x139   :  { %v2802_v15 = vadd.s32 3, %v1141_v45  ;;  %vm1212_vm8 = vc.u32 %v5242_v39, %v5245_v7  ;;  %v1213_v32 = vadd.s32 1, %v5246_v43  ;;  %v1270_v37 = vsel %vm1269_vm7, %v1268_v27, 0 }
 0x13a   :  { %v1131_v53 = vor.u32 4788187, %v1130_v23  ;;  %v1134_v20 = vcvt.s32.f32 %v1127_v55  ;;  %v1272_v5 = vand.u32 31, %v1270_v37  ;;  %v5269_v21 = vmul.f32 %v5266_v8, %v3994_v14 }
 0x13b   :  { %vm2701_vm9 = vcmp.eq.s32.totalorder %v5251_v16, 0  ;;  %vm1044_vm10 = vcmp.eq.s32.totalorder %v5254_v44, 0  ;;  %vm1047_vm11 = vcmp.eq.s32.totalorder %v5254_v44, 2  ;;  %v1214_v26 = vsel %vm1212_vm8, %v1213_v32, %v5246_v43 }
 0x13c   :  { %v1132_v63 = vand.u32 2147483647, %v1131_v53  ;;  %vm2700_vm12 = vcmp.lt.s32.totalorder %v5251_v16, 2  ;;  %v1215_v35 = vadd.s32 %v1214_v26, %v1210_v61  ;;  %v1266_v17 = vor.u32 8388608, %v1265_v33 }
 0x13d   :  { %v3996_v0 = vpop.eup %3995  ;;  %v1273_v51 = vsub.s32 32, %v1272_v5  ;;  %vm2704_vm13 = vcmp.eq.s32.totalorder %v5251_v16, 2  ;;  %v5277_v14 = vand.u32 3, %v2802_v15  ;;  %v5279_v48 = vand.u32 3, %v1141_v45 }
 0x13e   :  { %v3998_v11 = vpop.eup %3997  ;;  %v1048_v57 = vxor.u32 2147483648, %v3996_v0  ;;  %v1135_v46 = vmul.f32 %v1134_v20, %v1132_v63  ;;  %vm1043_vm14 = vcmp.lt.s32.totalorder %v5254_v44, 2  ;;  %v1216_v34 = vadd.s32 536870912, %v1215_v35 }
 0x13f   :  { %v1045_v12 = vxor.u32 2147483648, %v3998_v11  ;;  %v1275_v22 = vshll.u32 %v4051_v54, %v1272_v5  ;;  %v1276_v28 = vshrl.u32 %v4052_v56, %v1273_v51  ;;  %v1278_v40 = vshll.u32 %v4052_v56, %v1272_v5 }
 0x140   :  { %v1279_v50 = vshrl.u32 %v4053_v58, %v1273_v51  ;;  %v1364_v38 = vand.u32 2139095040, %v5269_v21  ;;  %v1136_v49 = vxor.u32 2147483648, %v1135_v46  ;;  %v5287_v4 = vshrl.u32 %v1216_v34, 30 }
 0x141   :  { %v5289_v52 = vshrl.u32 %v1270_v37, 5  ;;  %v5291_v18 = vshll.u32 %v1266_v17, 8  ;;  %v5293_v30 = vpop.eup %3999  ;;  %v2706_v2 = vsel %vm2704_vm13, %v1048_v57, %v3998_v11  ;;  %v1274_v25 = vshrl.u32 %v4051_v54, %v1273_v51 }
 0x142   :  { %v1281_v36 = vshll.u32 %v4053_v58, %v1272_v5  ;;  %v1284_v59 = vshll.u32 %v4054_v60, %v1272_v5  ;;  %v1137_v24 = vsel %vm1054_vm0, %v1136_v49, %v1135_v46  ;;  %v2703_v42 = vsel %vm2701_vm9, %v3996_v0, %v1045_v12 }
 0x143   :  { %v1218_v43 = vshll.u32 %v5287_v4, 30  ;;  %v1277_v13 = vor.u32 %v1276_v28, %v1275_v22  ;;  %vm1041_vm15 = vweird.f32 %v4928_v19  ;;  %v1140_v29 = vsel %vm5201_vm3, %v4941_v41, %v1137_v24 }
 0x144   :  { %v1280_v45 = vor.u32 %v1279_v50, %v1278_v40  ;;  %v1282_v27 = vshrl.u32 %v4054_v60, %v1273_v51  ;;  %v1285_v33 = vshrl.u32 %v4055_v62, %v1273_v51  ;;  %4001 = vcosq.f32 %v1140_v29 }
 0x145   :  { %v5311_v55 = vsub.s32 %v1215_v35, %v1218_v43  ;;  %v1287_v23 = vshll.u32 %v4055_v62, %v1272_v5  ;;  %v1288_v61 = vshrl.u32 %v4056_v6, %v1273_v51  ;;  %4003 = vsinq.f32 %v1140_v29 }
 0x146   :  { %v1049_v15 = vsel %vm1047_vm11, %v1048_v57, %v3998_v11  ;;  %v1283_v32 = vor.u32 %v1282_v27, %v1281_v36  ;;  %v1286_v37 = vor.u32 %v1285_v33, %v1284_v59  ;;  %v1046_v10 = vsel %vm1044_vm10, %v3996_v0, %v1045_v12 }
 0x147   :  { %vm1150_vm0 = vcmp.eq.s32.totalorder %v5279_v48, 2  ;;  %v1221_v53 = vsub.s32 0, %v5311_v55  ;;  %v1289_v20 = vor.u32 %v1288_v61, %v1287_v23  ;;  %vm1290_vm1 = vcmp.lt.s32.totalorder %v5289_v52, 1 }
 0x148   :  { %v2707_v5 = vsel %vm2700_vm12, %v2703_v42, %v2706_v2  ;;  %vm1147_vm3 = vcmp.eq.s32.totalorder %v5279_v48, 0  ;;  %vm1291_vm4 = vcmp.lt.s32.totalorder %v5289_v52, 2  ;;  %vm1292_vm5 = vcmp.lt.s32.totalorder %v5289_v52, 3 }
 0x149   :  { %vm1293_vm2 = vcmp.lt.s32.totalorder %v5289_v52, 4  ;;  %vm1146_vm6 = vcmp.lt.s32.totalorder %v5279_v48, 2  ;;  %v3721_v26 = vmin.u32 %v1221_v53, %v5311_v55  ;;  %v1298_v63 = vsel %vm1290_vm1, %v1277_v13, %v1280_v45 }
 0x14a   :  { %v1295_v0 = vsel %vm1293_vm2, %v1283_v32, 2102212464  ;;  %v1299_v35 = vsel %vm1293_vm2, %v1286_v37, 920167782  ;;  %vm1144_vm7 = vweird.f32 %v4941_v41  ;;  %v1050_v16 = vsel %vm1043_vm14, %v1046_v10, %v1049_v15 }
 0x14b   :  { %v1300_v17 = vsel %vm1292_vm5, %v1283_v32, %v1299_v35  ;;  %v1302_v51 = vsel %vm1290_vm1, %v1280_v45, %v1283_v32  ;;  %v1303_v11 = vsel %vm1293_vm2, %v1289_v20, 1326507024  ;;  %v1223_v57 = vclz %v3721_v26 }
 0x14c   :  { %v1294_v12 = vsel %vm1290_vm1, %v1274_v25, %v1277_v13  ;;  %v1301_v46 = vsel %vm1291_vm4, %v1298_v63, %v1300_v17  ;;  %v1304_v34 = vsel %vm1292_vm5, %v1286_v37, %v1303_v11  ;;  %v1296_v44 = vsel %vm1292_vm5, %v1280_v45, %v1295_v0 }
 0x14d   :  { %v1305_v22 = vsel %vm1291_vm4, %v1302_v51, %v1304_v34  ;;  %v5350_v28 = vmul.u32.u64.low %v5291_v18, %v1301_v46  ;;  %v5351_v40 = vmul.u32.u64.high %v5291_v18, %v1301_v46, %v5350_v28  ;;  %vm2804_vm8 = vcmp.lt.s32.totalorder %v5277_v14, 2 }
 0x14e   :  { %v3722_v50 = vadd.s32 4294967294, %v1223_v57  ;;  %v5356_v49 = vmul.u32.u64.low %v5291_v18, %v1305_v22  ;;  %v5357_v2 = vmul.u32.u64.high %v5291_v18, %v1305_v22, %v5356_v49  ;;  %vm2805_vm9 = vcmp.eq.s32.totalorder %v5277_v14, 0  ;;  %v4002_v59 = vpop.eup %4001 }
 0x14f   :  { %vm2808_vm10 = vcmp.eq.s32.totalorder %v5277_v14, 2  ;;  %vm1157_vm11 = vcmp.lt.s32.totalorder %v4988_v3, 0  ;;  %v1211_v25 = vadd.s32 %v5245_v7, %v5242_v39  ;;  %v1365_v36 = vshrl.u32 %v1364_v38, 23  ;;  %v4004_v13 = vpop.eup %4003 }
 0x150   :  { %v2708_v24 = vsel %vm1041_vm15, nan, %v2707_v5  ;;  %v1051_v42 = vsel %vm1041_vm15, nan, %v1050_v16  ;;  %vm3723_vm12 = vcmp.lt.s32.totalorder %v3722_v50, 0  ;;  %v1297_v43 = vsel %vm1291_vm4, %v1294_v12, %v1296_v44 }
 0x151   :  { %v1151_v29 = vxor.u32 2147483648, %v4002_v59  ;;  %v1226_v45 = vsel %vm3723_vm12, 0, %v3722_v50  ;;  %v1241_v27 = vsub.s32 4, %v5287_v4  ;;  %v1316_v39 = vadd.s32 1, %v5351_v40 }
 0x152   :  { %v1148_v7 = vxor.u32 2147483648, %v4004_v13  ;;  %v1227_v38 = vsub.s32 32, %v1226_v45  ;;  %v1228_v33 = vshll.u32 %v5311_v55, %v1226_v45  ;;  %v1231_v23 = vsub.s32 4294967266, %v1226_v45 }
 0x153   :  { %v2810_v19 = vsel %vm2808_vm10, %v1151_v29, %v4004_v13  ;;  %v1152_v61 = vsel %vm1150_vm0, %v1151_v29, %v4004_v13  ;;  %v1313_v52 = vmul.u32 %v5291_v18, %v1297_v43  ;;  %vm1315_vm13 = vc.u32 %v5357_v2, %v5350_v28 }
 0x154   :  { %v2807_v15 = vsel %vm2805_vm9, %v4002_v59, %v1148_v7  ;;  %v1149_v32 = vsel %vm1147_vm3, %v4002_v59, %v1148_v7  ;;  %v1229_v37 = vshrl.u32 %v1211_v25, %v1227_v38  ;;  %v1232_v55 = vadd.s32 127, %v1231_v23 }
 0x155   :  { %v2811_v10 = vsel %vm2804_vm8, %v2807_v15, %v2810_v19  ;;  %v1153_v53 = vsel %vm1146_vm6, %v1149_v32, %v1152_v61  ;;  %v1317_v20 = vsel %vm1315_vm13, %v1316_v39, %v5351_v40  ;;  %v3728_v18 = vadd.s32 4294967169, %v1365_v36 }
 0x156   :  { %v2812_v5 = vsel %vm1144_vm7, nan, %v2811_v10  ;;  %v1154_v26 = vsel %vm1144_vm7, nan, %v1153_v53  ;;  %v1230_v0 = vor.u32 %v1229_v37, %v1228_v33  ;;  %v1233_v63 = vshll.u32 %v1232_v55, 23 }
 0x157   :  { %v3453_v35 = vpack.c.bf16 %v2812_v5, %v2708_v24  ;;  %v3445_v16 = vpack.c.bf16 %v1154_v26, %v1051_v42  ;;  %v1318_v17 = vadd.s32 %v1317_v20, %v1313_v52  ;;  %v1361_v14 = vand.u32 2147483647, %v5269_v21 }
 0x158   :  { %v1234_v51 = vor.u32 4788187, %v1233_v63  ;;  %v1237_v11 = vcvt.s32.f32 %v1230_v0  ;;  %v1242_v48 = vsel %vm1157_vm11, %v1241_v27, %v5287_v4  ;;  %v1371_v12 = vadd.s32 1, %v3728_v18 }
 0x159   :  { %3824 = vmatprep.subr.bf16.mxu0 %v3453_v35  ;;  %v1319_v57 = vadd.s32 536870912, %v1318_v17  ;;  %vm5401_vm14 = vcmp.le.f32.partialorder %v1155_v47, 0.7853982  ;;  %v5407_v34 = vmul.f32 %v5266_v8, %v5293_v30  ;;  %v5410_v44 = vadd.s32 112, %v4088_v1 }
 0x15a   :  { %3825 = vmatpush3.bf16.msra.mxu0 %v3445_v16  ;;  %v1235_v46 = vand.u32 2147483647, %v1234_v51  ;;  %v1244_v4 = vsel %vm5401_vm14, 0, %v1242_v48  ;;  %v1368_v40 = vand.u32 8388607, %v1361_v14  ;;  %vm1372_vm15 = vcmp.gt.s32.totalorder %v1371_v12, 0 }
 0x15b   :  { %v1320_v22 = vshrl.u32 %v1319_v57, 30  ;;  %v1373_v50 = vsel %vm1372_vm15, %v1371_v12, 0  ;;  %v2906_v59 = vadd.s32 3, %v1244_v4  ;;  %v5417_v30 = vadd.s32 120, %v4088_v1 }
 0x15c   :  { %v1238_v47 = vmul.f32 %v1237_v11, %v1235_v46  ;;  %v1375_v25 = vand.u32 31, %v1373_v50  ;;  %v52_v24 = vcvt.s32.f32 %v5410_v44  ;;  %v1369_v43 = vor.u32 8388608, %v1368_v40 }
 0x15d   :  { %v1321_v49 = vshll.u32 %v1320_v22, 30  ;;  %v1467_v29 = vand.u32 2139095040, %v5407_v34  ;;  %vm1260_vm0 = vcmp.lt.s32.totalorder %v5159_v9, 0  ;;  %v5426_v27 = vand.u32 3, %v1244_v4 }
 0x15e   :  { %v1239_v36 = vxor.u32 2147483648, %v1238_v47  ;;  %v1376_v13 = vsub.s32 32, %v1375_v25  ;;  %v1464_v39 = vand.u32 2147483647, %v5407_v34  ;;  %v1378_v38 = vshll.u32 %v4051_v54, %v1375_v25 }
 0x15f   :  { %v5420_v42 = vsub.s32 %v1318_v17, %v1321_v49  ;;  %v1381_v33 = vshll.u32 %v4052_v56, %v1375_v25  ;;  %v1314_v23 = vadd.s32 %v5350_v28, %v5357_v2  ;;  %v5437_v19 = vand.u32 3, %v2906_v59 }
 0x160   :  { %v1240_v45 = vsel %vm1157_vm11, %v1239_v36, %v1238_v47  ;;  %v1379_v61 = vshrl.u32 %v4052_v56, %v1376_v13  ;;  %v1382_v52 = vshrl.u32 %v4053_v58, %v1376_v13  ;;  %vm5443_vm1 = vcmp.le.f32.partialorder %v1258_v31, 0.7853982 }
 0x161   :  { %v1243_v1 = vsel %vm5401_vm14, %v4988_v3, %v1240_v45  ;;  %v1324_v7 = vsub.s32 0, %v5420_v42  ;;  %v5448_v37 = vshrl.u32 %v1373_v50, 5  ;;  %v5450_v55 = vshll.u32 %v1369_v43, 8 }
 0x162   :  { %v1468_v10 = vshrl.u32 %v1467_v29, 23  ;;  %4005 = vcosq.f32 %v1243_v1  ;;  %v1344_v28 = vsub.s32 4, %v1320_v22  ;;  %v1384_v2 = vshll.u32 %v4053_v58, %v1375_v25 }
 0x163   :  { %v3725_v32 = vmin.u32 %v1324_v7, %v5420_v42  ;;  %v5455_v53 = vand.u32 8388607, %v1464_v39  ;;  %4007 = vsinq.f32 %v1243_v1  ;;  %v1380_v20 = vor.u32 %v1379_v61, %v1378_v38 }
 0x164   :  { %v1383_v18 = vor.u32 %v1382_v52, %v1381_v33  ;;  %v1385_v5 = vshrl.u32 %v4054_v60, %v1376_v13  ;;  %v1387_v26 = vshll.u32 %v4054_v60, %v1375_v25  ;;  %v1388_v0 = vshrl.u32 %v4055_v62, %v1376_v13 }
 0x165   :  { %v1326_v31 = vclz %v3725_v32  ;;  %v1390_v63 = vshll.u32 %v4055_v62, %v1375_v25  ;;  %v1391_v16 = vshrl.u32 %v4056_v6, %v1376_v13  ;;  %vm1393_vm3 = vcmp.lt.s32.totalorder %v5448_v37, 1 }
 0x166   :  { %v3732_v17 = vadd.s32 4294967169, %v1468_v10  ;;  %v1377_v51 = vshrl.u32 %v4051_v54, %v1376_v13  ;;  %v1386_v11 = vor.u32 %v1385_v5, %v1384_v2  ;;  %v1389_v48 = vor.u32 %v1388_v0, %v1387_v26 }
 0x167   :  { %v3726_v35 = vadd.s32 4294967294, %v1326_v31  ;;  %vm1396_vm4 = vcmp.lt.s32.totalorder %v5448_v37, 4  ;;  %v1345_v57 = vsel %vm1260_vm0, %v1344_v28, %v1320_v22  ;;  %v1392_v12 = vor.u32 %v1391_v16, %v1390_v63 }
 0x168   :  { %vm1395_vm2 = vcmp.lt.s32.totalorder %v5448_v37, 3  ;;  %vm2912_vm6 = vcmp.eq.s32.totalorder %v5437_v19, 2  ;;  %vm1394_vm7 = vcmp.lt.s32.totalorder %v5448_v37, 2  ;;  %v1401_v46 = vsel %vm1393_vm3, %v1380_v20, %v1383_v18 }
 0x169   :  { %vm3727_vm5 = vcmp.lt.s32.totalorder %v3726_v35, 0  ;;  %v1402_v4 = vsel %vm1396_vm4, %v1389_v48, 920167782  ;;  %vm2909_vm8 = vcmp.eq.s32.totalorder %v5437_v19, 0  ;;  %v1398_v22 = vsel %vm1396_vm4, %v1386_v11, 2102212464 }
 0x16a   :  { %v1329_v41 = vsel %vm3727_vm5, 0, %v3726_v35  ;;  %v1347_v49 = vsel %vm5443_vm1, 0, %v1345_v57  ;;  %v1397_v25 = vsel %vm1393_vm3, %v1377_v51, %v1380_v20  ;;  %v1403_v36 = vsel %vm1395_vm2, %v1386_v11, %v1402_v4 }
 0x16b   :  { %v1330_v40 = vsub.s32 32, %v1329_v41  ;;  %v1331_v47 = vshll.u32 %v5420_v42, %v1329_v41  ;;  %v1334_v50 = vsub.s32 4294967266, %v1329_v41  ;;  %v1406_v59 = vsel %vm1396_vm4, %v1392_v12, 1326507024 }
 0x16c   :  { %v1404_v13 = vsel %vm1394_vm7, %v1401_v46, %v1403_v36  ;;  %v1405_v29 = vsel %vm1393_vm3, %v1383_v18, %v1386_v11  ;;  %v5490_v45 = vpop.eup %4005  ;;  %v1399_v1 = vsel %vm1395_vm2, %v1383_v18, %v1398_v22  ;;  %v1407_v7 = vsel %vm1395_vm2, %v1389_v48, %v1406_v59 }
 0x16d   :  { %v1332_v43 = vshrl.u32 %v1314_v23, %v1330_v40  ;;  %v1335_v42 = vadd.s32 127, %v1334_v50  ;;  %v5497_v38 = vmul.u32.u64.low %v5450_v55, %v1404_v13  ;;  %v5498_v33 = vmul.u32.u64.high %v5450_v55, %v1404_v13, %v5497_v38  ;;  %v5501_v23 = vpop.eup %4007 }
 0x16e   :  { %v1474_v32 = vadd.s32 1, %v3732_v17  ;;  %v53_v10 = vcvt.s32.f32 %v5417_v30  ;;  %v3010_v28 = vadd.s32 3, %v1347_v49  ;;  %vm1253_vm9 = vcmp.eq.s32.totalorder %v5426_v27, 2 }
 0x16f   :  { %v1333_v61 = vor.u32 %v1332_v43, %v1331_v47  ;;  %v1336_v52 = vshll.u32 %v1335_v42, 23  ;;  %v1408_v2 = vsel %vm1394_vm7, %v1405_v29, %v1407_v7  ;;  %v68_v31 = vmul.f32 -0.071955785, %v52_v24 }
 0x170   :  { %v1254_v20 = vxor.u32 2147483648, %v5490_v45  ;;  %v1400_v26 = vsel %vm1394_vm7, %v1397_v25, %v1399_v1  ;;  %v1251_v0 = vxor.u32 2147483648, %v5501_v23  ;;  %v1472_v35 = vor.u32 8388608, %v5455_v53 }
 0x171   :  { %v1337_v18 = vor.u32 4788187, %v1336_v52  ;;  %v1340_v5 = vcvt.s32.f32 %v1333_v61  ;;  %v5514_v30 = vmul.u32.u64.low %v5450_v55, %v1408_v2  ;;  %v5515_v63 = vmul.u32.u64.high %v5450_v55, %v1408_v2, %v5514_v30 }
 0x172   :  { %v1419_v17 = vadd.s32 1, %v5498_v33  ;;  %vm1475_vm10 = vcmp.gt.s32.totalorder %v1474_v32, 0  ;;  %v5519_v44 = vmul.f32 -0.071955785, %v53_v10  ;;  %v5521_v24 = vand.u32 3, %v3010_v28 }
 0x173   :  { %v1338_v16 = vand.u32 2147483647, %v1337_v18  ;;  %v5523_v51 = vand.u32 3, %v1347_v49  ;;  %v1416_v37 = vmul.u32 %v5450_v55, %v1400_v26  ;;  %v1476_v11 = vsel %vm1475_vm10, %v1474_v32, 0 }
 0x174   :  { %v5529_v57 = vsel %vm2912_vm6, %v1254_v20, %v5501_v23  ;;  %vm1250_vm11 = vcmp.eq.s32.totalorder %v5426_v27, 0  ;;  %v1478_v53 = vand.u32 31, %v1476_v11  ;;  %v98_v12 = vmul.f32 1.442695, %v68_v31 }
 0x175   :  { %v1341_v48 = vmul.f32 %v1340_v5, %v1338_v16  ;;  %v5537_v41 = vsel %vm2909_vm8, %v5490_v45, %v1251_v0  ;;  %v5542_v55 = vsel %vm1253_vm9, %v1254_v20, %v5501_v23  ;;  %vm1418_vm12 = vc.u32 %v5515_v63, %v5497_v38 }
 0x176   :  { %v5546_v46 = vshrl.u32 %v1476_v11, 5  ;;  %v1420_v40 = vsel %vm1418_vm12, %v1419_v17, %v5498_v33  ;;  %v1479_v47 = vsub.s32 32, %v1478_v53  ;;  %v1481_v50 = vshll.u32 %v4051_v54, %v1478_v53  ;;  %v3931_v33 = vld [vmem:[%s5946_s1 + $0x4] ss:$8 sps:$4 sm:$0xff]  }
 0x177   :  { %v1342_v4 = vxor.u32 2147483648, %v1341_v48  ;;  %vm2908_vm13 = vcmp.lt.s32.totalorder %v5437_v19, 2  ;;  %vm1249_vm14 = vcmp.lt.s32.totalorder %v5426_v27, 2  ;;  %v1421_v22 = vadd.s32 %v1420_v40, %v1416_v37  ;;  %3533 = vmatprep.mubr.bf16.mxu0 %v3931_v33 }
 0x178   :  { %v1484_v49 = vshll.u32 %v4052_v56, %v1478_v53  ;;  %v1487_v25 = vshll.u32 %v4053_v58, %v1478_v53  ;;  %v1490_v36 = vshll.u32 %v4054_v60, %v1478_v53  ;;  %v1482_v43 = vshrl.u32 %v4052_v56, %v1479_v47 }
 0x179   :  { %v1343_v59 = vsel %vm1260_vm0, %v1342_v4, %v1341_v48  ;;  %v1485_v42 = vshrl.u32 %v4053_v58, %v1479_v47  ;;  %4009 = vpow2.f32 %v98_v12  ;;  %v1422_v29 = vadd.s32 536870912, %v1421_v22 }
 0x17a   :  { %v1346_v13 = vsel %vm5443_vm1, %v5159_v9, %v1343_v59  ;;  %v1488_v1 = vshrl.u32 %v4054_v60, %v1479_v47  ;;  %v1491_v7 = vshrl.u32 %v4055_v62, %v1479_v47  ;;  %vm1247_vm15 = vweird.f32 %v4988_v3 }
 0x17b   :  { %4011 = vcosq.f32 %v1346_v13  ;;  %v1483_v61 = vor.u32 %v1482_v43, %v1481_v50  ;;  %v1486_v52 = vor.u32 %v1485_v42, %v1484_v49  ;;  %v1493_v32 = vshll.u32 %v4055_v62, %v1478_v53 }
 0x17c   :  { %4013 = vsinq.f32 %v1346_v13  ;;  %v5569_v10 = vshrl.u32 %v1422_v29, 30  ;;  %v1489_v15 = vor.u32 %v1488_v1, %v1487_v25  ;;  %v1492_v28 = vor.u32 %v1491_v7, %v1490_v36 }
 0x17d   :  { %vm1356_vm0 = vcmp.eq.s32.totalorder %v5523_v51, 2  ;;  %v1480_v2 = vshrl.u32 %v4051_v54, %v1479_v47  ;;  %v1494_v31 = vshrl.u32 %v4056_v6, %v1479_v47  ;;  %vm1496_vm1 = vcmp.lt.s32.totalorder %v5546_v46, 1 }
 0x17e   :  { %vm1498_vm3 = vcmp.lt.s32.totalorder %v5546_v46, 3  ;;  %vm1353_vm4 = vcmp.eq.s32.totalorder %v5523_v51, 0  ;;  %v1424_v20 = vshll.u32 %v5569_v10, 30  ;;  %vm1497_vm5 = vcmp.lt.s32.totalorder %v5546_v46, 2 }
 0x17f   :  { %vm1499_vm2 = vcmp.lt.s32.totalorder %v5546_v46, 4  ;;  %v1512_v18 = vshll.u32 %v1472_v35, 8  ;;  %vm1352_vm6 = vcmp.lt.s32.totalorder %v5523_v51, 2  ;;  %v1495_v5 = vor.u32 %v1494_v31, %v1493_v32 }
 0x180   :  { %v1501_v26 = vsel %vm1499_vm2, %v1489_v15, 2102212464  ;;  %v1504_v30 = vsel %vm1496_vm1, %v1483_v61, %v1486_v52  ;;  %v1505_v16 = vsel %vm1499_vm2, %v1492_v28, 920167782  ;;  %vm1350_vm7 = vweird.f32 %v5159_v9 }
 0x181   :  { %v1252_v35 = vsel %vm1250_vm11, %v5490_v45, %v1251_v0  ;;  %v5593_v17 = vsub.s32 %v1421_v22, %v1424_v20  ;;  %v1506_v37 = vsel %vm1498_vm3, %v1489_v15, %v1505_v16  ;;  %v100_v11 = vmul.f32 1.442695, %v5519_v44 }
 0x182   :  { %v1500_v48 = vsel %vm1496_vm1, %v1480_v2, %v1483_v61  ;;  %v1502_v53 = vsel %vm1498_vm3, %v1486_v52, %v1501_v26  ;;  %v1507_v23 = vsel %vm1497_vm5, %v1504_v30, %v1506_v37  ;;  %v1508_v12 = vsel %vm1496_vm1, %v1486_v52, %v1489_v15 }
 0x183   :  { %v1427_v45 = vsub.s32 0, %v5593_v17  ;;  %v1509_v0 = vsel %vm1499_vm2, %v1495_v5, 1326507024  ;;  %v5609_v4 = vmul.u32.u64.low %v1512_v18, %v1507_v23  ;;  %v5610_v40 = vmul.u32.u64.high %v1512_v18, %v1507_v23, %v5609_v4  ;;  %v4010_v44 = vpop.eup %4009 }
 0x184   :  { %v2915_v47 = vsel %vm2908_vm13, %v5537_v41, %v5529_v57  ;;  %vm3012_vm8 = vcmp.lt.s32.totalorder %v5521_v24, 2  ;;  %v1256_v50 = vsel %vm1249_vm14, %v1252_v35, %v5542_v55  ;;  %v1510_v22 = vsel %vm1498_vm3, %v1492_v28, %v1509_v0  ;;  %v3457_v35 = vld [vmem:[%s5947_s2] sm:$0xff] }
 0x185   :  { %v3729_v49 = vmin.u32 %v1427_v45, %v5593_v17  ;;  %v1503_v25 = vsel %vm1497_vm5, %v1500_v48, %v1502_v53  ;;  %v1511_v36 = vsel %vm1497_vm5, %v1508_v12, %v1510_v22  ;;  %4015 = vpow2.f32 %v100_v11  ;;  %v4012_v19 = vpop.eup %4011  ;;  %v3459_v53 = vld [vmem:[%s5947_s2 + $0x10] sm:$0xff] }
 0x186   :  { %vm3013_vm9 = vcmp.eq.s32.totalorder %v5521_v24, 0  ;;  %vm3016_vm10 = vcmp.eq.s32.totalorder %v5521_v24, 2  ;;  %v5630_v57 = vmul.u32.u64.low %v1512_v18, %v1511_v36  ;;  %v5631_v27 = vmul.u32.u64.high %v1512_v18, %v1511_v36, %v5630_v57  ;;  %v4014_v41 = vpop.eup %4013 }
 0x187   :  { %v1357_v55 = vxor.u32 2147483648, %v4012_v19  ;;  %v2916_v59 = vsel %vm1247_vm15, nan, %v2915_v47  ;;  %v1429_v43 = vclz %v3729_v49  ;;  %v1522_v42 = vadd.s32 1, %v5610_v40 }
 0x188   :  { %v1354_v13 = vxor.u32 2147483648, %v4014_v41  ;;  %v1257_v46 = vsel %vm1247_vm15, nan, %v1256_v50  ;;  %v1417_v29 = vadd.s32 %v5497_v38, %v5515_v63  ;;  %v1519_v1 = vmul.u32 %v1512_v18, %v1503_v25 }
 0x189   :  { %v3018_v7 = vsel %vm3016_vm10, %v1357_v55, %v4014_v41  ;;  %v1358_v33 = vsel %vm1356_vm0, %v1357_v55, %v4014_v41  ;;  %v3730_v61 = vadd.s32 4294967294, %v1429_v43  ;;  %v1447_v52 = vsub.s32 4, %v5569_v10 }
 0x18a   :  { %v3015_v32 = vsel %vm3013_vm9, %v4012_v19, %v1354_v13  ;;  %v1355_v15 = vsel %vm1353_vm4, %v4012_v19, %v1354_v13  ;;  %vm1521_vm11 = vc.u32 %v5631_v27, %v5609_v4  ;;  %v5650_v3 = vmul.f32 %v5266_v8, %v4010_v44 }
 0x18b   :  { %v3019_v38 = vsel %vm3012_vm8, %v3015_v32, %v3018_v7  ;;  %v1359_v63 = vsel %vm1352_vm6, %v1355_v15, %v1358_v33  ;;  %vm3731_vm12 = vcmp.lt.s32.totalorder %v3730_v61, 0  ;;  %v1523_v28 = vsel %vm1521_vm11, %v1522_v42, %v5610_v40 }
 0x18c   :  { %v3020_v2 = vsel %vm1350_vm7, nan, %v3019_v38  ;;  %v1360_v31 = vsel %vm1350_vm7, nan, %v1359_v63  ;;  %v1432_v20 = vsel %vm3731_vm12, 0, %v3730_v61  ;;  %v1524_v18 = vadd.s32 %v1523_v28, %v1519_v1  ;;  %v3580_v1 = vld [vmem:[%s5948_s4] sm:$0xff]  ;;  %v3581_v61 = vld [vmem:[%s5948_s4 + $0x8] sm:$0xff] }
 0x18d   :  { %v3454_v5 = vpack.c.bf16 %v3020_v2, %v2916_v59  ;;  %v3446_v26 = vpack.c.bf16 %v1360_v31, %v1257_v46  ;;  %v1433_v30 = vsub.s32 32, %v1432_v20  ;;  %v1434_v24 = vshll.u32 %v5593_v17, %v1432_v20 }
 0x18e   :  { %vm1363_vm13 = vcmp.lt.s32.totalorder %v5269_v21, 0  ;;  %v1437_v51 = vsub.s32 4294967266, %v1432_v20  ;;  %v1525_v16 = vadd.s32 536870912, %v1524_v18  ;;  %v1567_v9 = vand.u32 2147483647, %v5650_v3 }
 0x18f   :  { %v4016_v37 = vpop.eup %4015  ;;  %3826 = vmatprep.subr.bf16.mxu0 %v3454_v5  ;;  %v1435_v11 = vshrl.u32 %v1417_v29, %v1433_v30  ;;  %v1570_v48 = vand.u32 2139095040, %v5650_v3  ;;  %v1448_v23 = vsel %vm1363_vm13, %v1447_v52, %v5569_v10  ;;  %v4057_v45 = vmov 0   ;;  %v3458_v10 = vld [vmem:[%s5947_s2 + $0x8] sm:$0xff]  ;;  %v3582_v5 = vld [vmem:[%s5948_s4 + $0x10] sm:$0xff] }
 0x190   :  { %3827 = vmatpush3.bf16.msra.mxu0 %v3446_v26  ;;  %v1438_v17 = vadd.s32 127, %v1437_v51  ;;  %v1526_v12 = vshrl.u32 %v1525_v16, 30  ;;  %3927 = vset.pattern.permute.xlu0 %v4057_v45  ;;  %v5675_v40 = vmul.f32 %v5266_v8, %v4016_v37  ;;  %vm5679_vm14 = vcmp.le.f32.partialorder %v1361_v14, 0.7853982  ;;  %v3460_v14 = vld [vmem:[%s5947_s2 + $0x18] sm:$0xff] }
 0x191   :  { %v1436_v0 = vor.u32 %v1435_v11, %v1434_v24  ;;  %v1571_v44 = vshrl.u32 %v1570_v48, 23  ;;  %3463 = vperm.xlu0 %3927, %v3457_v35   ;;  %3928 = vset.pattern.permute.xlu1 %v4057_v45  ;;  %v1450_v8 = vsel %vm5679_vm14, 0, %v1448_v23  ;;  %v1574_v36 = vand.u32 8388607, %v1567_v9 }
 0x192   :  { %v1439_v50 = vshll.u32 %v1438_v17, 23  ;;  %v1527_v22 = vshll.u32 %v1526_v12, 30  ;;  %v1550_v49 = vsub.s32 4, %v1526_v12  ;;  %3473 = vperm.xlu1 %3928, %v3459_v53   ;;  %vm1466_vm15 = vcmp.lt.s32.totalorder %v5407_v34, 0 }
 0x193   :  { %v3736_v25 = vadd.s32 4294967169, %v1571_v44  ;;  %v1443_v57 = vcvt.s32.f32 %v1436_v0  ;;  %vm5698_vm0 = vcmp.le.f32.partialorder %v1464_v39, 0.7853982  ;;  %v1673_v42 = vand.u32 2139095040, %v5675_v40 }
 0x194   :  { %v1440_v19 = vor.u32 4788187, %v1439_v50  ;;  %v5694_v41 = vsub.s32 %v1524_v18, %v1527_v22  ;;  %v1551_v59 = vsel %vm1466_vm15, %v1550_v49, %v1526_v12  ;;  %v3114_v29 = vadd.s32 3, %v1450_v8 }
 0x195   :  { %v1577_v43 = vadd.s32 1, %v3736_v25  ;;  %3468 = vperm.xlu0 %3927, %v3458_v10   ;;  %v1575_v39 = vor.u32 8388608, %v1574_v36  ;;  %v1670_v7 = vand.u32 2147483647, %v5675_v40  ;;  %v1674_v33 = vshrl.u32 %v1673_v42, 23 }
 0x196   :  { %v1441_v13 = vand.u32 2147483647, %v1440_v19  ;;  %v1530_v46 = vsub.s32 0, %v5694_v41  ;;  %3478 = vperm.xlu1 %3928, %v3460_v14   ;;  %v5716_v15 = vsel %vm5698_vm0, 0, %v1551_v59  ;;  %v5718_v38 = vand.u32 3, %v1450_v8 }
 0x197   :  { %vm1578_vm1 = vcmp.gt.s32.totalorder %v1577_v43, 0  ;;  %v3740_v28 = vadd.s32 4294967169, %v1674_v33  ;;  %v1520_v31 = vadd.s32 %v5609_v4, %v5631_v27  ;;  %v5722_v18 = vand.u32 3, %v3114_v29  ;;  %v3583_v4 = vld [vmem:[%s5948_s4 + $0x18] sm:$0xff] }
 0x198   :  { %v1444_v52 = vmul.f32 %v1443_v57, %v1441_v13  ;;  %v3733_v32 = vmin.u32 %v1530_v46, %v5694_v41  ;;  %v1579_v63 = vsel %vm1578_vm1, %v1577_v43, 0  ;;  %v5728_v26 = vadd.s32 3, %v5716_v15 }
 0x199   :  { %3586 = vperm.xlu0 %3927, %v3580_v1   ;;  %v1581_v30 = vand.u32 31, %v1579_v63  ;;  %v5730_v24 = vshll.u32 %v1575_v39, 8  ;;  %v5734_v51 = vand.u32 8388607, %v1670_v7  ;;  %v1580_v35 = vshrl.u32 %v1579_v63, 5 }
 0x19a   :  { %v1445_v2 = vxor.u32 2147483648, %v1444_v52  ;;  %v1532_v20 = vclz %v3733_v32  ;;  %3591 = vperm.xlu1 %3928, %v3581_v61   ;;  %v5741_v37 = vadd.s32 1, %v3740_v28  ;;  %vm3120_vm4 = vcmp.eq.s32.totalorder %v5722_v18, 2 }
 0x19b   :  { %v1582_v48 = vsub.s32 32, %v1581_v30  ;;  %v1584_v53 = vshll.u32 %v4051_v54, %v1581_v30  ;;  %v1587_v17 = vshll.u32 %v4052_v56, %v1581_v30  ;;  %v1590_v23 = vshll.u32 %v4053_v58, %v1581_v30 }
 0x19c   :  { %v1446_v27 = vsel %vm1363_vm13, %v1445_v2, %v1444_v52  ;;  %v3734_v16 = vadd.s32 4294967294, %v1532_v20  ;;  %v1593_v12 = vshll.u32 %v4054_v60, %v1581_v30  ;;  %v1596_v36 = vshll.u32 %v4055_v62, %v1581_v30 }
 0x19d   :  { %v1449_v11 = vsel %vm5679_vm14, %v5269_v21, %v1446_v27  ;;  %3596 = vperm.xlu0 %3927, %v3582_v5   ;;  %v1583_v0 = vshrl.u32 %v4051_v54, %v1582_v48  ;;  %v1585_v44 = vshrl.u32 %v4052_v56, %v1582_v48  ;;  %v1588_v49 = vshrl.u32 %v4053_v58, %v1582_v48 }
 0x19e   :  { %4017 = vcosq.f32 %v1449_v11  ;;  %vm3735_vm3 = vcmp.lt.s32.totalorder %v3734_v16, 0  ;;  %3601 = vperm.xlu1 %3928, %v3583_v4   ;;  %v1591_v8 = vshrl.u32 %v4054_v60, %v1582_v48  ;;  %v1594_v25 = vshrl.u32 %v4055_v62, %v1582_v48 }
 0x19f   :  { %4019 = vsinq.f32 %v1449_v11  ;;  %v1535_v45 = vsel %vm3735_vm3, 0, %v3734_v16  ;;  %v1586_v10 = vor.u32 %v1585_v44, %v1584_v53  ;;  %v1589_v57 = vor.u32 %v1588_v49, %v1587_v17 }
 0x1a0   :  { %v1536_v47 = vsub.s32 32, %v1535_v45  ;;  %v1537_v50 = vshll.u32 %v5694_v41, %v1535_v45  ;;  %v1540_v22 = vsub.s32 4294967266, %v1535_v45  ;;  %v1597_v59 = vshrl.u32 %v4056_v6, %v1582_v48 }
 0x1a1   :  { %v1592_v43 = vor.u32 %v1591_v8, %v1590_v23  ;;  %v1595_v42 = vor.u32 %v1594_v25, %v1593_v12  ;;  %vm1599_vm5 = vcmp.lt.s32.totalorder %v1580_v35, 1  ;;  %vm1600_vm2 = vcmp.lt.s32.totalorder %v1580_v35, 2 }
 0x1a2   :  { %v1538_v14 = vshrl.u32 %v1520_v31, %v1536_v47  ;;  %v1541_v19 = vadd.s32 127, %v1540_v22  ;;  %v1598_v46 = vor.u32 %v1597_v59, %v1596_v36  ;;  %vm1601_vm6 = vcmp.lt.s32.totalorder %v1580_v35, 3 }
 0x1a3   :  { %vm1602_vm7 = vcmp.lt.s32.totalorder %v1580_v35, 4  ;;  %v1603_v29 = vsel %vm1599_vm5, %v1583_v0, %v1586_v10  ;;  %v1607_v1 = vsel %vm1599_vm5, %v1586_v10, %v1589_v57  ;;  %v1611_v39 = vsel %vm1599_vm5, %v1589_v57, %v1592_v43 }
 0x1a4   :  { %v1539_v41 = vor.u32 %v1538_v14, %v1537_v50  ;;  %v1542_v13 = vshll.u32 %v1541_v19, 23  ;;  %v1604_v52 = vsel %vm1602_vm7, %v1592_v43, 2102212464  ;;  %v1608_v32 = vsel %vm1602_vm7, %v1595_v42, 920167782 }
 0x1a5   :  { %v1605_v63 = vsel %vm1601_vm6, %v1589_v57, %v1604_v52  ;;  %v1609_v28 = vsel %vm1601_vm6, %v1592_v43, %v1608_v32  ;;  %v1612_v2 = vsel %vm1602_vm7, %v1598_v46, 1326507024  ;;  %vm1681_vm8 = vcmp.gt.s32.totalorder %v5741_v37, 0 }
 0x1a6   :  { %v1543_v33 = vor.u32 4788187, %v1542_v13  ;;  %v1546_v61 = vcvt.s32.f32 %v1539_v41  ;;  %v1606_v5 = vsel %vm1600_vm2, %v1603_v29, %v1605_v63  ;;  %v1610_v30 = vsel %vm1600_vm2, %v1607_v1, %v1609_v28 }
 0x1a7   :  { %v1613_v4 = vsel %vm1601_vm6, %v1595_v42, %v1612_v2  ;;  %v5770_v48 = vmul.u32.u64.low %v5730_v24, %v1610_v30  ;;  %v5771_v53 = vmul.u32.u64.high %v5730_v24, %v1610_v30, %v5770_v48  ;;  %vm3117_vm9 = vcmp.eq.s32.totalorder %v5722_v18, 0 }
 0x1a8   :  { %v5762_v31 = vpop.eup %4017  ;;  %v1544_v20 = vand.u32 2147483647, %v1543_v33  ;;  %v1614_v11 = vsel %vm1600_vm2, %v1611_v39, %v1613_v4  ;;  %vm1456_vm10 = vcmp.eq.s32.totalorder %v5718_v38, 0  ;;  %vm1459_vm11 = vcmp.eq.s32.totalorder %v5718_v38, 2 }
 0x1a9   :  { %v4020_v27 = vpop.eup %4019  ;;  %v1460_v16 = vxor.u32 2147483648, %v5762_v31  ;;  %v5775_v12 = vmul.u32.u64.low %v5730_v24, %v1614_v11  ;;  %v5776_v45 = vmul.u32.u64.high %v5730_v24, %v1614_v11, %v5775_v12  ;;  %v1682_v35 = vsel %vm1681_vm8, %v5741_v37, 0 }
 0x1aa   :  { %v1457_v17 = vxor.u32 2147483648, %v4020_v27  ;;  %v1547_v23 = vmul.f32 %v1546_v61, %v1544_v20  ;;  %v5785_v44 = vand.u32 3, %v5728_v26  ;;  %v5788_v47 = vand.u32 3, %v5716_v15 }
 0x1ab   :  { %v1678_v50 = vor.u32 8388608, %v5734_v51  ;;  %v3122_v22 = vsel %vm3120_vm4, %v1460_v16, %v4020_v27  ;;  %v1622_v49 = vmul.u32 %v5730_v24, %v1606_v5  ;;  %v1625_v10 = vadd.s32 1, %v5771_v53 }
 0x1ac   :  { %v1548_v0 = vxor.u32 2147483648, %v1547_v23  ;;  %v1684_v8 = vand.u32 31, %v1682_v35  ;;  %vm3116_vm12 = vcmp.lt.s32.totalorder %v5722_v18, 2  ;;  %v3119_v15 = vsel %vm3117_vm9, %v5762_v31, %v1457_v17 }
 0x1ad   :  { %v1461_v26 = vsel %vm1459_vm11, %v1460_v16, %v4020_v27  ;;  %v5801_v25 = vshrl.u32 %v1682_v35, 5  ;;  %vm1455_vm13 = vcmp.lt.s32.totalorder %v5718_v38, 2  ;;  %vm1624_vm14 = vc.u32 %v5776_v45, %v5770_v48 }
 0x1ae   :  { %v1549_v37 = vsel %vm1466_vm15, %v1548_v0, %v1547_v23  ;;  %v1685_v24 = vsub.s32 32, %v1684_v8  ;;  %v1687_v36 = vshll.u32 %v4051_v54, %v1684_v8  ;;  %v1626_v14 = vsel %vm1624_vm14, %v1625_v10, %v5771_v53 }
 0x1af   :  { %v1552_v51 = vsel %vm5698_vm0, %v5407_v34, %v1549_v37  ;;  %v1690_v19 = vshll.u32 %v4052_v56, %v1684_v8  ;;  %v1693_v57 = vshll.u32 %v4053_v58, %v1684_v8  ;;  %vm1453_vm15 = vweird.f32 %v5269_v21 }
 0x1b0   :  { %4021 = vcosq.f32 %v1552_v51  ;;  %v1627_v55 = vadd.s32 %v1626_v14, %v1622_v49  ;;  %v1686_v59 = vshrl.u32 %v4051_v54, %v1685_v24  ;;  %v1688_v43 = vshrl.u32 %v4052_v56, %v1685_v24 }
 0x1b1   :  { %4023 = vsinq.f32 %v1552_v51  ;;  %vm1562_vm0 = vcmp.eq.s32.totalorder %v5788_v47, 2  ;;  %v1691_v42 = vshrl.u32 %v4053_v58, %v1685_v24  ;;  %v1694_v41 = vshrl.u32 %v4054_v60, %v1685_v24 }
 0x1b2   :  { %v1696_v13 = vshll.u32 %v4054_v60, %v1684_v8  ;;  %v1697_v46 = vshrl.u32 %v4055_v62, %v1685_v24  ;;  %vm3221_vm1 = vcmp.eq.s32.totalorder %v5785_v44, 0  ;;  %vm1559_vm3 = vcmp.eq.s32.totalorder %v5788_v47, 0 }
 0x1b3   :  { %v1628_v29 = vadd.s32 536870912, %v1627_v55  ;;  %v1689_v1 = vor.u32 %v1688_v43, %v1687_v36  ;;  %v1699_v54 = vshll.u32 %v4055_v62, %v1684_v8  ;;  %v1700_v56 = vshrl.u32 %v4056_v6, %v1685_v24 }
 0x1b4   :  { %vm3220_vm4 = vcmp.lt.s32.totalorder %v5785_v44, 2  ;;  %vm1558_vm5 = vcmp.lt.s32.totalorder %v5788_v47, 2  ;;  %v1692_v58 = vor.u32 %v1691_v42, %v1690_v19  ;;  %v1695_v39 = vor.u32 %v1694_v41, %v1693_v57 }
 0x1b5   :  { %v1698_v33 = vor.u32 %v1697_v46, %v1696_v13  ;;  %vm1702_vm2 = vcmp.lt.s32.totalorder %v5801_v25, 1  ;;  %vm1556_vm6 = vweird.f32 %v5407_v34  ;;  %v1458_v60 = vsel %vm1456_vm10, %v5762_v31, %v1457_v17 }
 0x1b6   :  { %v5832_v61 = vshrl.u32 %v1628_v29, 30  ;;  %v1701_v62 = vor.u32 %v1700_v56, %v1699_v54  ;;  %vm1704_vm7 = vcmp.lt.s32.totalorder %v5801_v25, 3  ;;  %vm1703_vm8 = vcmp.lt.s32.totalorder %v5801_v25, 2 }
 0x1b7   :  { %vm1705_vm9 = vcmp.lt.s32.totalorder %v5801_v25, 4  ;;  %v1706_v6 = vsel %vm1702_vm2, %v1686_v59, %v1689_v1  ;;  %v1710_v52 = vsel %vm1702_vm2, %v1689_v1, %v1692_v58  ;;  %v1714_v2 = vsel %vm1702_vm2, %v1692_v58, %v1695_v39 }
 0x1b8   :  { %v1630_v32 = vshll.u32 %v5832_v61, 30  ;;  %v1707_v63 = vsel %vm1705_vm9, %v1695_v39, 2102212464  ;;  %v1711_v28 = vsel %vm1705_vm9, %v1698_v33, 920167782  ;;  %v1718_v30 = vshll.u32 %v1678_v50, 8 }
 0x1b9   :  { %v1708_v20 = vsel %vm1704_vm7, %v1692_v58, %v1707_v63  ;;  %v1712_v31 = vsel %vm1704_vm7, %v1695_v39, %v1711_v28  ;;  %v1715_v5 = vsel %vm1705_vm9, %v1701_v62, 1326507024  ;;  %v3123_v4 = vsel %vm3116_vm12, %v3119_v15, %v3122_v22 }
 0x1ba   :  { %vm3224_vm10 = vcmp.eq.s32.totalorder %v5785_v44, 2  ;;  %v1631_v27 = vsub.s32 %v1627_v55, %v1630_v32  ;;  %v1713_v16 = vsel %vm1703_vm8, %v1710_v52, %v1712_v31  ;;  %v4022_v11 = vpop.eup %4021  ;;  %v1462_v53 = vsel %vm1455_vm13, %v1458_v60, %v1461_v26 }
 0x1bb   :  { %v1716_v17 = vsel %vm1704_vm7, %v1698_v33, %v1715_v5  ;;  %v5851_v23 = vmul.u32.u64.low %v1718_v30, %v1713_v16  ;;  %v5852_v12 = vmul.u32.u64.high %v1718_v30, %v1713_v16, %v5851_v23  ;;  %v4024_v35 = vpop.eup %4023  ;;  %v1563_v0 = vxor.u32 2147483648, %v4022_v11 }
 0x1bc   :  { %v1633_v18 = vsub.s32 0, %v1631_v27  ;;  %v1709_v50 = vsel %vm1703_vm8, %v1706_v6, %v1708_v20  ;;  %v1717_v22 = vsel %vm1703_vm8, %v1714_v2, %v1716_v17  ;;  %v1560_v49 = vxor.u32 2147483648, %v4024_v35 }
 0x1bd   :  { %v3124_v38 = vsel %vm1453_vm15, nan, %v3123_v4  ;;  %v5860_v10 = vmul.u32.u64.low %v1718_v30, %v1717_v22  ;;  %v5861_v8 = vmul.u32.u64.high %v1718_v30, %v1717_v22, %v5860_v10  ;;  %v3226_v37 = vsel %vm3224_vm10, %v1563_v0, %v4024_v35 }
 0x1be   :  { %v1463_v15 = vsel %vm1453_vm15, nan, %v1462_v53  ;;  %v1564_v26 = vsel %vm1562_vm0, %v1563_v0, %v4024_v35  ;;  %v3737_v51 = vmin.u32 %v1633_v18, %v1631_v27  ;;  %v3223_v25 = vsel %vm3221_vm1, %v4022_v11, %v1560_v49 }
 0x1bf   :  { %v1561_v24 = vsel %vm1559_vm3, %v4022_v11, %v1560_v49  ;;  %v1725_v36 = vmul.u32 %v1718_v30, %v1709_v50  ;;  %v1728_v14 = vadd.s32 1, %v5852_v12  ;;  %v3227_v19 = vsel %vm3220_vm4, %v3223_v25, %v3226_v37 }
 0x1c0   :  { %v1565_v21 = vsel %vm1558_vm5, %v1561_v24, %v1564_v26  ;;  %v1635_v57 = vclz %v3737_v51  ;;  %v3228_v55 = vsel %vm1556_vm6, nan, %v3227_v19  ;;  %vm1727_vm11 = vc.u32 %v5861_v8, %v5851_v23 }
 0x1c1   :  { %v1566_v59 = vsel %vm1556_vm6, nan, %v1565_v21  ;;  %v3455_v43 = vpack.c.bf16 %v3228_v55, %v3124_v38  ;;  %v1729_v13 = vsel %vm1727_vm11, %v1728_v14, %v5852_v12  ;;  %v1623_v44 = vadd.s32 %v5770_v48, %v5776_v45 }
 0x1c2   :  { %v3447_v42 = vpack.c.bf16 %v1566_v59, %v1463_v15  ;;  %v3738_v41 = vadd.s32 4294967294, %v1635_v57  ;;  %v1730_v46 = vadd.s32 %v1729_v13, %v1725_v36  ;;  %vm1569_vm13 = vcmp.lt.s32.totalorder %v5650_v3, 0 }
 0x1c3   :  { %3828 = vmatprep.subr.bf16.mxu0 %v3455_v43  ;;  %v1726_v5 = vadd.s32 %v5851_v23, %v5861_v8  ;;  %vm5890_vm15 = vcmp.le.f32.partialorder %v1567_v9, 0.7853982  ;;  %v1653_v35 = vsub.s32 4, %v5832_v61  ;;  %vm1672_vm0 = vcmp.lt.s32.totalorder %v5675_v40, 0 }
 0x1c4   :  { %vm3739_vm12 = vcmp.lt.s32.totalorder %v3738_v41, 0  ;;  %3829 = vmatpush3.bf16.msra.mxu0 %v3447_v42  ;;  %v1731_v29 = vadd.s32 536870912, %v1730_v46  ;;  %vm1671_vm1 = vcmp.le.f32.partialorder %v1670_v7, 0.7853982  ;;  %vm1659_vm8 = vweird.f32 %v5650_v3 }
 0x1c5   :  { %v1638_v47 = vsel %vm3739_vm12, 0, %v3738_v41  ;;  %v1654_v22 = vsel %vm1569_vm13, %v1653_v35, %v5832_v61 }
 0x1c6   :  { %v1639_v1 = vsub.s32 32, %v1638_v47  ;;  %v1640_v54 = vshll.u32 %v1631_v27, %v1638_v47  ;;  %v1643_v34 = vsub.s32 4294967266, %v1638_v47  ;;  %v1732_v56 = vshrl.u32 %v1731_v29, 30 }
 0x1c7   :  { %v1656_v10 = vsel %vm5890_vm15, 0, %v1654_v22 }
 0x1c8   :  { %v1641_v58 = vshrl.u32 %v1623_v44, %v1639_v1  ;;  %v1644_v39 = vadd.s32 127, %v1643_v34  ;;  %v1733_v33 = vshll.u32 %v1732_v56, 30  ;;  %v1756_v38 = vsub.s32 4, %v1732_v56 }
 0x1c9   :  { %v3322_v26 = vadd.s32 3, %v1656_v10  ;;  %v1660_v19 = vand.u32 3, %v1656_v10 }
 0x1ca   :  { %v1642_v60 = vor.u32 %v1641_v58, %v1640_v54  ;;  %v1645_v62 = vshll.u32 %v1644_v39, 23  ;;  %v1734_v6 = vsub.s32 %v1730_v46, %v1733_v33  ;;  %v1757_v15 = vsel %vm1672_vm0, %v1756_v38, %v1732_v56 }
 0x1cb   :  { %v1759_v24 = vsel %vm1671_vm1, 0, %v1757_v15  ;;  %v3323_v14 = vand.u32 3, %v3322_v26  ;;  %vm1662_vm5 = vcmp.eq.s32.totalorder %v1660_v19, 0  ;;  %vm1665_vm2 = vcmp.eq.s32.totalorder %v1660_v19, 2 }
 0x1cc   :  { %v1646_v52 = vor.u32 4788187, %v1645_v62  ;;  %v1649_v32 = vcvt.s32.f32 %v1642_v60  ;;  %v1736_v63 = vsub.s32 0, %v1734_v6  ;;  %v3426_v21 = vadd.s32 3, %v1759_v24 }
 0x1cd   :  { %vm3325_vm3 = vcmp.eq.s32.totalorder %v3323_v14, 0  ;;  %vm3328_vm4 = vcmp.eq.s32.totalorder %v3323_v14, 2  ;;  %v1763_v59 = vand.u32 3, %v1759_v24  ;;  %vm3324_vm6 = vcmp.lt.s32.totalorder %v3323_v14, 2 }
 0x1ce   :  { %v1647_v28 = vand.u32 2147483647, %v1646_v52  ;;  %v3741_v2 = vmin.u32 %v1736_v63, %v1734_v6  ;;  %v3427_v7 = vand.u32 3, %v3426_v21  ;;  %vm1661_vm7 = vcmp.lt.s32.totalorder %v1660_v19, 2 }
 0x1cf   :  { %vm1765_vm10 = vcmp.eq.s32.totalorder %v1763_v59, 0  ;;  %vm1768_vm11 = vcmp.eq.s32.totalorder %v1763_v59, 2 }
 0x1d0   :  { %v1650_v48 = vmul.f32 %v1649_v32, %v1647_v28  ;;  %v1738_v45 = vclz %v3741_v2  ;;  %vm3432_vm9 = vcmp.eq.s32.totalorder %v3427_v7, 2  ;;  %vm3429_vm12 = vcmp.eq.s32.totalorder %v3427_v7, 0  ;;  %v3932_v2 = vld [vmem:[%s5946_s1 + $0x14] ss:$8 sps:$4 sm:$0xff]  }
 0x1d2   :  { %v1651_v20 = vxor.u32 2147483648, %v1650_v48  ;;  %v3742_v31 = vadd.s32 4294967294, %v1738_v45 }
 0x1d4   :  { %vm3743_vm14 = vcmp.lt.s32.totalorder %v3742_v31, 0  ;;  %v1652_v27 = vsel %vm1569_vm13, %v1651_v20, %v1650_v48  ;;  %vm3428_vm13 = vcmp.lt.s32.totalorder %v3427_v7, 2  ;;  %v3935_v48 = vld [vmem:[%s5949_s3] sm:$0xff]  }
 0x1d5   :  { %v1741_v4 = vsel %vm3743_vm14, 0, %v3742_v31  ;;  %v1655_v23 = vsel %vm5890_vm15, %v5650_v3, %v1652_v27  ;;  %vm1764_vm14 = vcmp.lt.s32.totalorder %v1763_v59, 2  ;;  %vm1762_vm15 = vweird.f32 %v5675_v40  ;;  %v3934_v3 = vld [vmem:[%s5946_s1 + $0x10] ss:$8 sps:$4 sm:$0xff]  }
 0x1d6   :  { %v1742_v16 = vsub.s32 32, %v1741_v4  ;;  %v1743_v11 = vshll.u32 %v1734_v6, %v1741_v4  ;;  %v1746_v53 = vsub.s32 4294967266, %v1741_v4  ;;  %4025 = vcosq.f32 %v1655_v23 }
 0x1d7   :  { %4027 = vsinq.f32 %v1655_v23 }
 0x1d8   :  { %v1744_v17 = vshrl.u32 %v1726_v5, %v1742_v16  ;;  %v1747_v12 = vadd.s32 127, %v1746_v53 }
 0x1da   :  { %v1745_v0 = vor.u32 %v1744_v17, %v1743_v11  ;;  %v1748_v9 = vshll.u32 %v1747_v12, 23 }
 0x1dc   :  { %v1749_v18 = vor.u32 4788187, %v1748_v9  ;;  %v1752_v50 = vcvt.s32.f32 %v1745_v0 }
 0x1de   :  { %v1750_v49 = vand.u32 2147483647, %v1749_v18 }
 0x1e0   :  { %v1753_v8 = vmul.f32 %v1752_v50, %v1750_v49  ;;  %v4026_v61 = vpop.eup %4025 }
 0x1e1   :  { %v4028_v36 = vpop.eup %4027  ;;  %v1666_v55 = vxor.u32 2147483648, %v4026_v61 }
 0x1e2   :  { %v1754_v37 = vxor.u32 2147483648, %v1753_v8  ;;  %v1663_v57 = vxor.u32 2147483648, %v4028_v36 }
 0x1e3   :  { %v3330_v42 = vsel %vm3328_vm4, %v1666_v55, %v4028_v36  ;;  %v1667_v13 = vsel %vm1665_vm2, %v1666_v55, %v4028_v36 }
 0x1e4   :  { %v1755_v51 = vsel %vm1672_vm0, %v1754_v37, %v1753_v8  ;;  %v3327_v43 = vsel %vm3325_vm3, %v4026_v61, %v1663_v57  ;;  %v1664_v41 = vsel %vm1662_vm5, %v4026_v61, %v1663_v57  ;;  %vm3614_vm0 = vcmask 261120  }
 0x1e5   :  { %v1758_v25 = vsel %vm1671_vm1, %v5675_v40, %v1755_v51  ;;  %v3331_v29 = vsel %vm3324_vm6, %v3327_v43, %v3330_v42  ;;  %v1668_v1 = vsel %vm1661_vm7, %v1664_v41, %v1667_v13  ;;  %v3929_v40 = vld [vmem:[%s5946_s1] ss:$8 sps:$4 sm:$0xff]   ;;  %3852 = vmatprep.mubr.msk.bf16.mxu1 %vm3614_vm0, %v3935_v48  ;;  %vm3670_vm1 = vcmask 64512  }
 0x1e6   :  { %4029 = vcosq.f32 %v1758_v25  ;;  %v3332_v58 = vsel %vm1659_vm8, nan, %v3331_v29  ;;  %v1669_v33 = vsel %vm1659_vm8, nan, %v1668_v1  ;;  %v3936_v1 = vld [vmem:[%s5949_s3 + $0x8] sm:$0xff]  }
 0x1e7   :  { %4031 = vsinq.f32 %v1758_v25 }
 0x1f0   :  { %v4030_v46 = vpop.eup %4029 }
 0x1f1   :  { %v4032_v44 = vpop.eup %4031  ;;  %v1769_v47 = vxor.u32 2147483648, %v4030_v46 }
 0x1f2   :  { %v1766_v54 = vxor.u32 2147483648, %v4032_v44 }
 0x1f3   :  { %v3434_v34 = vsel %vm3432_vm9, %v1769_v47, %v4032_v44  ;;  %v1770_v56 = vsel %vm1768_vm11, %v1769_v47, %v4032_v44 }
 0x1f4   :  { %v3431_v39 = vsel %vm3429_vm12, %v4030_v46, %v1766_v54  ;;  %v1767_v60 = vsel %vm1765_vm10, %v4030_v46, %v1766_v54 }
 0x1f5   :  { %v3435_v62 = vsel %vm3428_vm13, %v3431_v39, %v3434_v34  ;;  %v1771_v6 = vsel %vm1764_vm14, %v1767_v60, %v1770_v56 }
 0x1f6   :  { %v3436_v52 = vsel %vm1762_vm15, nan, %v3435_v62  ;;  %v1772_v32 = vsel %vm1762_vm15, nan, %v1771_v6 }
 0x1f7   :  { %v3456_v63 = vpack.c.bf16 %v3436_v52, %v3332_v58  ;;  %v3448_v28 = vpack.c.bf16 %v1772_v32, %v1669_v33 }
 0x1f9   :  { %3830 = vmatprep.subr.bf16.mxu0 %v3456_v63 }
 0x1fa   :  { %3831 = vmatpush3.bf16.msra.mxu0 %v3448_v28 }
 0x1fd   :  { %3534 = vmatmul.mubr.bf16.vlgmr.msra.gmra.mrb[0].mxu0 %v3929_v40 }
 0x1fe   :  { %3541 = vmatprep.mubr.bf16.mxu0 %v3932_v2 }
 0x205   :  { %3542 = vmatmul.mubr.bf16.gmra.mrb[4].mxu0 %v3934_v3 }
 0x210   :  { %v3464_v45 = vpop.permute.xlu0 %3463 }
 0x211   :  { %v3474_v12 = vpop.permute.xlu1 %3473 }
 0x214   :  { %v3469_v11 = vpop.permute.xlu0 %3468 }
 0x215   :  { %v3479_v8 = vpop.permute.xlu1 %3478 }
 0x218   :  { %v3587_v54 = vpop.permute.xlu0 %3586 }
 0x219   :  { %v3592_v34 = vpop.permute.xlu1 %3591 }
 0x21c   :  { %v3597_v56 = vpop.permute.xlu0 %3596 }
 0x21d   :  { %v3602_v60 = vpop.permute.xlu1 %3601 }
 0x2d0   :  { %v3832_v20 = vpop.f32.mrb[0].mxu0 }
 0x2d1   :  { %v3833_v31 = vpop.f32.mrb[1].mxu0 }
 0x2d2   :  { %v3834_v5 = vadd.f32 %v3833_v31, %v3832_v20  ;;  %v3835_v30 = vpop.f32.mrb[2].mxu0 }
 0x2d3   :  { %v3836_v4 = vpop.f32.mrb[3].mxu0 }
 0x2d4   :  { %v3536_v27 = vadd.f32 %v3834_v5, %v3464_v45  ;;  %v3837_v16 = vadd.f32 %v3836_v4, %v3835_v30 }
 0x2d6   :  { %v3550_v53 = vsub.f32 0.0, %v3536_v27  ;;  %v3539_v17 = vadd.f32 %v3837_v16, %v3469_v11 }
 0x2d8   :  { %v3554_v35 = vmul.f32 1.442695, %v3550_v53  ;;  %v3551_v23 = vsub.f32 0.0, %v3539_v17  ;;  %v3838_v0 = vpop.f32.mrb[4].mxu0 }
 0x2d9   :  { %v3839_v9 = vpop.f32.mrb[5].mxu0 }
 0x2da   :  { %4033 = vpow2.f32 %v3554_v35  ;;  %v3556_v18 = vmul.f32 1.442695, %v3551_v23  ;;  %v3840_v50 = vadd.f32 %v3839_v9, %v3838_v0  ;;  %v3841_v22 = vpop.f32.mrb[6].mxu0 }
 0x2db   :  { %v3842_v49 = vpop.f32.mrb[7].mxu0 }
 0x2dc   :  { %4035 = vpow2.f32 %v3556_v18  ;;  %v3544_v38 = vadd.f32 %v3840_v50, %v3474_v12  ;;  %v3843_v10 = vadd.f32 %v3842_v49, %v3841_v22 }
 0x2de   :  { %v3552_v37 = vsub.f32 0.0, %v3544_v38  ;;  %v3547_v15 = vadd.f32 %v3843_v10, %v3479_v8 }
 0x2e0   :  { %v3558_v26 = vmul.f32 1.442695, %v3552_v37  ;;  %v3553_v51 = vsub.f32 0.0, %v3547_v15 }
 0x2e2   :  { %4037 = vpow2.f32 %v3558_v26  ;;  %v3560_v25 = vmul.f32 1.442695, %v3553_v51 }
 0x2e4   :  { %v4034_v24 = vpop.eup %4033  ;;  %4039 = vpow2.f32 %v3560_v25 }
 0x2e5   :  { %v3562_v61 = vadd.f32 1.0, %v4034_v24 }
 0x2e6   :  { %v4036_v36 = vpop.eup %4035 }
 0x2e7   :  { %4041 = vrcp.f32 %v3562_v61  ;;  %v3563_v14 = vadd.f32 1.0, %v4036_v36 }
 0x2e9   :  { %4043 = vrcp.f32 %v3563_v14 }
 0x2ec   :  { %v4038_v19 = vpop.eup %4037 }
 0x2ed   :  { %v3564_v21 = vadd.f32 1.0, %v4038_v19 }
 0x2ee   :  { %v4040_v57 = vpop.eup %4039 }
 0x2ef   :  { %4045 = vrcp.f32 %v3564_v21  ;;  %v3565_v55 = vadd.f32 1.0, %v4040_v57 }
 0x2f1   :  { %v4042_v7 = vpop.eup %4041  ;;  %4047 = vrcp.f32 %v3565_v55 }
 0x2f2   :  { %v3570_v43 = vmul.f32 %v4042_v7, %v3536_v27 }
 0x2f3   :  { %v4044_v59 = vpop.eup %4043 }
 0x2f4   :  { %v3571_v42 = vmul.f32 %v4044_v59, %v3539_v17 }
 0x2f6   :  { %v3578_v41 = vpack.c.bf16 %v3571_v42, %v3570_v43 }
 0x2f8   :  { %3848 = vmatprep.subr.bf16.mxu1 %v3578_v41 }
 0x2f9   :  { %v4046_v13 = vpop.eup %4045  ;;  %3849 = vmatpush3.bf16.msra.mxu1 %v3578_v41 }
 0x2fa   :  { %v3572_v44 = vmul.f32 %v4046_v13, %v3544_v38 }
 0x2fb   :  { %v4048_v46 = vpop.eup %4047 }
 0x2fc   :  { %v3573_v47 = vmul.f32 %v4048_v46, %v3547_v15 }
 0x2fe   :  { %v3579_v29 = vpack.c.bf16 %v3573_v47, %v3572_v44 }
 0x300   :  { %3850 = vmatprep.subr.bf16.mxu1 %v3579_v29 }
 0x301   :  { %3851 = vmatpush3.bf16.msra.mxu1 %v3579_v29 }
 0x304   :  { %3853 = vmatmul.mubr.msk.bf16.vlgmr.msra.gmra.mrb[0].mxu1 %vm3614_vm0, %v3936_v1 }
 0x3d7   :  { %v3854_v58 = vpop.f32.mrb[0].mxu1 }
 0x3d8   :  { %v3664_v39 = vadd.f32 %v3854_v58, %v3597_v56  ;;  %v3655_v33 = vpop.f32.mrb[1].mxu1 }
 0x3d9   :  { %v3656_v62 = vadd.f32 %v3655_v33, %v3587_v54  ;;  %v3855_v6 = vpop.f32.mrb[2].mxu1 }
 0x3da   :  { %3673 = vst.msk [vmem:[%s5950_s5 + $0x10] sm:$0xff] %vm3670_vm1, %v3664_v39  ;;  %v3667_v52 = vadd.f32 %v3855_v6, %v3602_v60  ;;  %v3658_v32 = vpop.f32.mrb[3].mxu1 }
 0x3db   :  { %3671 = vst.msk [vmem:[%s5950_s5] sm:$0xff] %vm3670_vm1, %v3656_v62  ;;  %v3659_v63 = vadd.f32 %v3658_v32, %v3592_v34 }
 0x3dc   :  { %3674 = vst.msk [vmem:[%s5950_s5 + $0x18] sm:$0xff] %vm3670_vm1, %v3667_v52 }
 0x3dd   :  { %3672 = vst.msk [vmem:[%s5950_s5 + $0x8] sm:$0xff] %vm3670_vm1, %v3659_v63 }

</bundles_post_ra>
